<compile_context>
chip_gen: v7x
topology: tpu7x:2x2x1
jax: 0.10.0
libtpu: 0.0.40
codegen_flags: <defaults>
</compile_context>

<pallas_src>
import functools

import jax
import jax.numpy as jnp
from jax.experimental import pallas as pl
from jax.experimental.pallas import tpu as pltpu

LANE = 128  # TPU lane width: padded feature dims are multiples of this.


def _round_up(n, m):
    return ((n + m - 1) // m) * m


def _cdiv(a, b):
    return -(-a // b)


def _critic_kernel(x_ref, a_ref,
                   w1_ref, b1_ref,
                   w2h_ref, w2a_ref, b2_ref,
                   w3_ref, b3_ref,
                   w4_ref, b4_ref,
                   o_ref):
    # f32 tiles come in; cast to bf16 once for the MXU, accumulate in f32,
    # do bias-add + ReLU on the f32 accumulator, then cast the ReLU output
    # to bf16 in one shot so any spilled intermediate is bf16.
    x = x_ref[...].astype(jnp.bfloat16)    # (TB, S)
    a = a_ref[...].astype(jnp.bfloat16)    # (TB, A)

    # fc1 + relu
    h1 = jnp.maximum(
        jnp.dot(x, w1_ref[...], preferred_element_type=jnp.float32) + b1_ref[...],
        0.0).astype(jnp.bfloat16)

    # fc2 over cat([h1, action]) + relu  (concat expressed as two matmuls)
    h2 = jnp.maximum(
        jnp.dot(h1, w2h_ref[...], preferred_element_type=jnp.float32)
        + jnp.dot(a, w2a_ref[...], preferred_element_type=jnp.float32)
        + b2_ref[...],
        0.0).astype(jnp.bfloat16)

    # fc3 + relu
    h3 = jnp.maximum(
        jnp.dot(h2, w3_ref[...], preferred_element_type=jnp.float32) + b3_ref[...],
        0.0).astype(jnp.bfloat16)

    # fc4 (no activation) -> lane-dense 128-wide bf16 output slab
    o_ref[...] = (
        jnp.dot(h3, w4_ref[...], preferred_element_type=jnp.float32)
        + b4_ref[...]).astype(o_ref.dtype)


def pack_critic_params(params):
    """Cast weights to bf16 and zero-pad feature dims to lane multiples.

    Padding is numerically exact: padded bias entries are 0, relu(0) = 0, and
    the matching padded weight rows/cols are 0, so padded lanes contribute
    nothing to downstream matmuls and are sliced off at the output.
    """
    s_dim = params["w1"].shape[0]
    a_dim = params["w4"].shape[1]
    f1 = params["w1"].shape[1]
    f2 = params["w2h"].shape[1]
    f3 = params["w3"].shape[1]
    f1p, f2p, f3p = _round_up(f1, LANE), _round_up(f2, LANE), _round_up(f3, LANE)
    outp = _round_up(a_dim, LANE)

    def pad2(w, rows, cols, dtype):
        out = jnp.zeros((rows, cols), dtype)
        return out.at[:w.shape[0], :w.shape[1]].set(w.astype(dtype))

    return {
        "w1":  pad2(params["w1"], s_dim, f1p, jnp.bfloat16),
        "b1":  pad2(params["b1"], 1, f1p, jnp.float32),
        "w2h": pad2(params["w2h"], f1p, f2p, jnp.bfloat16),
        "w2a": pad2(params["w2a"], a_dim, f2p, jnp.bfloat16),
        "b2":  pad2(params["b2"], 1, f2p, jnp.float32),
        "w3":  pad2(params["w3"], f2p, f3p, jnp.bfloat16),
        "b3":  pad2(params["b3"], 1, f3p, jnp.float32),
        "w4":  pad2(params["w4"], f3p, outp, jnp.bfloat16),
        "b4":  pad2(params["b4"], 1, outp, jnp.float32),
    }


@functools.partial(jax.jit, static_argnames=("tile_b",))
def critic_forward(x, action, packed, *, tile_b=512):
    """Run the Critic forward pass as a single batch-tiled Pallas TPU kernel.

    x:      (B, state_space)   f32
    action: (B, action_space)  f32
    packed: output of pack_critic_params (all jnp arrays, no Python scalars)
    returns (B, action_space) f32
    """
    B, S = x.shape
    A = action.shape[1]              # static from the array shape

    F1 = packed["w1"].shape[1]
    F2 = packed["w2h"].shape[1]
    F3 = packed["w3"].shape[1]
    OUT_PAD = packed["w4"].shape[1]

    # Batch tile: multiple of 16 (bf16 packed sublane tile), capped at tile_b,
    # and small enough that moderate batches still produce >= 2 grid steps so
    # v7x's two TensorCores both get work.
    TB = min(tile_b, _round_up(max(_cdiv(B, 2), 1), 16))
    B_pad = _round_up(B, TB)
    grid = (B_pad // TB,)

    # Zero-pad batch rows to a tile multiple (no dtype change; bf16 cast is
    # done inside the kernel so there is no extra wrapper pass over inputs).
    x_p = jnp.pad(x, ((0, B_pad - B), (0, 0)))
    a_p = jnp.pad(action, ((0, B_pad - B), (0, 0)))

    # Activation tiles march over the batch; weights/biases stay resident.
    def batch_map(i):
        return (i, 0)

    def const_map(i):
        return (0, 0)

    in_specs = [
        pl.BlockSpec((TB, S), batch_map),          # x
        pl.BlockSpec((TB, A), batch_map),          # action
        pl.BlockSpec((S, F1), const_map),          # w1
        pl.BlockSpec((1, F1), const_map),          # b1
        pl.BlockSpec((F1, F2), const_map),         # w2h
        pl.BlockSpec((A, F2), const_map),          # w2a
        pl.BlockSpec((1, F2), const_map),          # b2
        pl.BlockSpec((F2, F3), const_map),         # w3
        pl.BlockSpec((1, F3), const_map),          # b3
        pl.BlockSpec((F3, OUT_PAD), const_map),    # w4 (lane-padded)
        pl.BlockSpec((1, OUT_PAD), const_map),     # b4 (lane-padded)
    ]
    out_spec = pl.BlockSpec((TB, OUT_PAD), batch_map)
    out_shape = jax.ShapeDtypeStruct((B_pad, OUT_PAD), jnp.bfloat16)

    # All CostEstimate fields must be plain Python ints (static shapes only).
    flops = int(2 * B_pad * (S * F1 + F1 * F2 + A * F2 + F2 * F3 + F3 * OUT_PAD))
    weight_bytes = int(sum(int(v.size) * v.dtype.itemsize for v in packed.values()))
    bytes_accessed = int(weight_bytes
                         + B_pad * S * 4 + B_pad * A * 4    # f32 activations in
                         + B_pad * OUT_PAD * 2)             # bf16 output slab

    q_pad = pl.pallas_call(
        _critic_kernel,
        out_shape=out_shape,
        grid_spec=pltpu.PrefetchScalarGridSpec(
            num_scalar_prefetch=0,
            grid=grid,
            in_specs=in_specs,
            out_specs=out_spec,
        ),
        compiler_params=pltpu.CompilerParams(
            dimension_semantics=("parallel",),
            vmem_limit_bytes=64 * 1024 * 1024,
        ),
        cost_estimate=pl.CostEstimate(
            flops=flops, transcendentals=0, bytes_accessed=bytes_accessed),
    )(x_p, a_p,
      packed["w1"], packed["b1"],
      packed["w2h"], packed["w2a"], packed["b2"],
      packed["w3"], packed["b3"],
      packed["w4"], packed["b4"])

    return q_pad[:B, :A].astype(jnp.float32)


def init_critic_params(key, state_space, action_space,
                       fc1_units=800, fc2_units=400, fc3_units=200):
    """Uniform init mirroring the PyTorch module's reset_parameters.

    Note: the original hidden_init uses weight.size()[0] (== out_features for
    nn.Linear), so lim = 1/sqrt(out_features) for fc1..fc3; fc4 keeps the
    default nn.Linear bound ~ 1/sqrt(fan_in).  Weights stored as (in, out).
    """
    def uniform(k, shape, lim):
        return jax.random.uniform(k, shape, jnp.float32, minval=-lim, maxval=lim)

    ks = jax.random.split(key, 8)
    lim1 = 1.0 / jnp.sqrt(float(fc1_units))
    lim2 = 1.0 / jnp.sqrt(float(fc2_units))
    lim3 = 1.0 / jnp.sqrt(float(fc3_units))
    lim4 = 1.0 / jnp.sqrt(float(fc3_units))

    w2_full = uniform(ks[2], (fc1_units + action_space, fc2_units), lim2)
    return {
        "w1":  uniform(ks[0], (state_space, fc1_units), lim1),
        "b1":  uniform(ks[1], (1, fc1_units), lim1),
        # split W2 into the fc1-output part and the action part (== concat)
        "w2h": w2_full[:fc1_units, :],
        "w2a": w2_full[fc1_units:, :],
        "b2":  uniform(ks[3], (1, fc2_units), lim2),
        "w3":  uniform(ks[4], (fc2_units, fc3_units), lim3),
        "b3":  uniform(ks[5], (1, fc3_units), lim3),
        "w4":  uniform(ks[6], (fc3_units, action_space), lim4),
        "b4":  uniform(ks[7], (1, action_space), lim4),
    }


def critic_reference(x, action, p):
    """Plain-JAX reference mirroring the kernel's bf16-operand / f32-acc math."""
    def mm(lhs, rhs):
        return jnp.dot(lhs.astype(jnp.bfloat16), rhs.astype(jnp.bfloat16),
                       preferred_element_type=jnp.float32)

    h1 = jax.nn.relu(mm(x, p["w1"]) + p["b1"])
    h2 = jax.nn.relu(mm(h1, p["w2h"]) + mm(action, p["w2a"]) + p["b2"])
    h3 = jax.nn.relu(mm(h2, p["w3"]) + p["b3"])
    return mm(h3, p["w4"]) + p["b4"]


if __name__ == "__main__":
    # Small shapes consistent with the module constructor (default fc sizes).
    B, STATE, ACTION = 2, 32, 8
    FC1, FC2, FC3 = 800, 400, 200

    key = jax.random.PRNGKey(0)
    k_params, k_x, k_a = jax.random.split(key, 3)

    params = init_critic_params(k_params, STATE, ACTION, FC1, FC2, FC3)
    packed = pack_critic_params(params)

    x = jax.random.normal(k_x, (B, STATE), jnp.float32)
    action = jax.random.normal(k_a, (B, ACTION), jnp.float32)

    q = critic_forward(x, action, packed)
    q = jax.block_until_ready(q)

    q_ref = critic_reference(x, action, params)
    assert q.shape == (B, ACTION)
    assert jnp.allclose(q, q_ref, atol=1e-2, rtol=1e-2), "mismatch vs JAX reference"

    print("KERNEL_OK")
</pallas_src>

<mosaic_0001>
module attributes {stable_mosaic.version = 11 : i64} {
  func.func @_critic_kernel(%arg0: i32, %arg1: memref<16x32xf32, #tpu.memory_space<vmem>>, %arg2: memref<16x8xf32, #tpu.memory_space<vmem>>, %arg3: memref<32x896xbf16, #tpu.memory_space<vmem>>, %arg4: memref<1x896xf32, #tpu.memory_space<vmem>>, %arg5: memref<896x512xbf16, #tpu.memory_space<vmem>>, %arg6: memref<8x512xbf16, #tpu.memory_space<vmem>>, %arg7: memref<1x512xf32, #tpu.memory_space<vmem>>, %arg8: memref<512x256xbf16, #tpu.memory_space<vmem>>, %arg9: memref<1x256xf32, #tpu.memory_space<vmem>>, %arg10: memref<256x128xbf16, #tpu.memory_space<vmem>>, %arg11: memref<1x128xf32, #tpu.memory_space<vmem>>, %arg12: memref<16x128xbf16, #tpu.memory_space<vmem>>) attributes {dimension_semantics = [#tpu.dimension_semantics<parallel>], iteration_bounds = array<i64: 1>, scalar_prefetch = 0 : i64, scratch_operands = 0 : i64, tpu.core_type = #tpu.core_type<tc>, window_params = [{transform_indices = @transform_0, window_bounds = array<i64: 16, 32>}, {transform_indices = @transform_1, window_bounds = array<i64: 16, 8>}, {pipeline_mode = #tpu.pipeline_mode<synchronous>, transform_indices = @transform_2, window_bounds = array<i64: 32, 896>}, {pipeline_mode = #tpu.pipeline_mode<synchronous>, transform_indices = @transform_3, window_bounds = array<i64: 1, 896>}, {pipeline_mode = #tpu.pipeline_mode<synchronous>, transform_indices = @transform_4, window_bounds = array<i64: 896, 512>}, {pipeline_mode = #tpu.pipeline_mode<synchronous>, transform_indices = @transform_5, window_bounds = array<i64: 8, 512>}, {pipeline_mode = #tpu.pipeline_mode<synchronous>, transform_indices = @transform_6, window_bounds = array<i64: 1, 512>}, {pipeline_mode = #tpu.pipeline_mode<synchronous>, transform_indices = @transform_7, window_bounds = array<i64: 512, 256>}, {pipeline_mode = #tpu.pipeline_mode<synchronous>, transform_indices = @transform_8, window_bounds = array<i64: 1, 256>}, {pipeline_mode = #tpu.pipeline_mode<synchronous>, transform_indices = @transform_9, window_bounds = array<i64: 256, 128>}, {pipeline_mode = #tpu.pipeline_mode<synchronous>, transform_indices = @transform_10, window_bounds = array<i64: 1, 128>}, {transform_indices = @transform_11, window_bounds = array<i64: 16, 128>}]} {
    %c0 = arith.constant 0 : index
    %c0_0 = arith.constant 0 : index
    %0 = vector.load %arg1[%c0, %c0_0] : memref<16x32xf32, #tpu.memory_space<vmem>>, vector<16x32xf32>
    %1 = arith.truncf %0 : vector<16x32xf32> to vector<16x32xbf16>
    %c0_1 = arith.constant 0 : index
    %c0_2 = arith.constant 0 : index
    %2 = vector.load %arg2[%c0_1, %c0_2] : memref<16x8xf32, #tpu.memory_space<vmem>>, vector<16x8xf32>
    %3 = arith.truncf %2 : vector<16x8xf32> to vector<16x8xbf16>
    %c0_3 = arith.constant 0 : index
    %c0_4 = arith.constant 0 : index
    %4 = vector.load %arg3[%c0_3, %c0_4] : memref<32x896xbf16, #tpu.memory_space<vmem>>, vector<32x896xbf16>
    %cst = arith.constant dense<0.000000e+00> : vector<16x896xf32>
    %5 = tpu.matmul %1, %4, %cst {dimension_numbers = #tpu.dot_dimension_numbers<[1], [0], [0], [1], [0, 0, 1, 1], [], []>} : vector<16x32xbf16>, vector<32x896xbf16>, vector<16x896xf32> -> vector<16x896xf32>
    %c0_5 = arith.constant 0 : index
    %c0_6 = arith.constant 0 : index
    %6 = vector.load %arg4[%c0_5, %c0_6] : memref<1x896xf32, #tpu.memory_space<vmem>>, vector<1x896xf32>
    %7 = vector.broadcast %6 : vector<1x896xf32> to vector<16x896xf32>
    %8 = arith.addf %5, %7 : vector<16x896xf32>
    %cst_7 = arith.constant 0.000000e+00 : f32
    %9 = vector.broadcast %cst_7 : f32 to vector<16x896xf32>
    %10 = arith.maximumf %8, %9 : vector<16x896xf32>
    %11 = arith.truncf %10 : vector<16x896xf32> to vector<16x896xbf16>
    %c0_8 = arith.constant 0 : index
    %c0_9 = arith.constant 0 : index
    %12 = vector.load %arg5[%c0_8, %c0_9] : memref<896x512xbf16, #tpu.memory_space<vmem>>, vector<896x512xbf16>
    %cst_10 = arith.constant dense<0.000000e+00> : vector<16x512xf32>
    %13 = tpu.matmul %11, %12, %cst_10 {dimension_numbers = #tpu.dot_dimension_numbers<[1], [0], [0], [1], [0, 0, 1, 1], [], []>} : vector<16x896xbf16>, vector<896x512xbf16>, vector<16x512xf32> -> vector<16x512xf32>
    %c0_11 = arith.constant 0 : index
    %c0_12 = arith.constant 0 : index
    %14 = vector.load %arg6[%c0_11, %c0_12] : memref<8x512xbf16, #tpu.memory_space<vmem>>, vector<8x512xbf16>
    %cst_13 = arith.constant dense<0.000000e+00> : vector<16x512xf32>
    %15 = tpu.matmul %3, %14, %cst_13 {dimension_numbers = #tpu.dot_dimension_numbers<[1], [0], [0], [1], [0, 0, 1, 1], [], []>} : vector<16x8xbf16>, vector<8x512xbf16>, vector<16x512xf32> -> vector<16x512xf32>
    %16 = arith.addf %13, %15 : vector<16x512xf32>
    %c0_14 = arith.constant 0 : index
    %c0_15 = arith.constant 0 : index
    %17 = vector.load %arg7[%c0_14, %c0_15] : memref<1x512xf32, #tpu.memory_space<vmem>>, vector<1x512xf32>
    %18 = vector.broadcast %17 : vector<1x512xf32> to vector<16x512xf32>
    %19 = arith.addf %16, %18 : vector<16x512xf32>
    %cst_16 = arith.constant 0.000000e+00 : f32
    %20 = vector.broadcast %cst_16 : f32 to vector<16x512xf32>
    %21 = arith.maximumf %19, %20 : vector<16x512xf32>
    %22 = arith.truncf %21 : vector<16x512xf32> to vector<16x512xbf16>
    %c0_17 = arith.constant 0 : index
    %c0_18 = arith.constant 0 : index
    %23 = vector.load %arg8[%c0_17, %c0_18] : memref<512x256xbf16, #tpu.memory_space<vmem>>, vector<512x256xbf16>
    %cst_19 = arith.constant dense<0.000000e+00> : vector<16x256xf32>
    %24 = tpu.matmul %22, %23, %cst_19 {dimension_numbers = #tpu.dot_dimension_numbers<[1], [0], [0], [1], [0, 0, 1, 1], [], []>} : vector<16x512xbf16>, vector<512x256xbf16>, vector<16x256xf32> -> vector<16x256xf32>
    %c0_20 = arith.constant 0 : index
    %c0_21 = arith.constant 0 : index
    %25 = vector.load %arg9[%c0_20, %c0_21] : memref<1x256xf32, #tpu.memory_space<vmem>>, vector<1x256xf32>
    %26 = vector.broadcast %25 : vector<1x256xf32> to vector<16x256xf32>
    %27 = arith.addf %24, %26 : vector<16x256xf32>
    %cst_22 = arith.constant 0.000000e+00 : f32
    %28 = vector.broadcast %cst_22 : f32 to vector<16x256xf32>
    %29 = arith.maximumf %27, %28 : vector<16x256xf32>
    %30 = arith.truncf %29 : vector<16x256xf32> to vector<16x256xbf16>
    %c0_23 = arith.constant 0 : index
    %c0_24 = arith.constant 0 : index
    %31 = vector.load %arg10[%c0_23, %c0_24] : memref<256x128xbf16, #tpu.memory_space<vmem>>, vector<256x128xbf16>
    %cst_25 = arith.constant dense<0.000000e+00> : vector<16x128xf32>
    %32 = tpu.matmul %30, %31, %cst_25 {dimension_numbers = #tpu.dot_dimension_numbers<[1], [0], [0], [1], [0, 0, 1, 1], [], []>} : vector<16x256xbf16>, vector<256x128xbf16>, vector<16x128xf32> -> vector<16x128xf32>
    %c0_26 = arith.constant 0 : index
    %c0_27 = arith.constant 0 : index
    %33 = vector.load %arg11[%c0_26, %c0_27] : memref<1x128xf32, #tpu.memory_space<vmem>>, vector<1x128xf32>
    %34 = vector.broadcast %33 : vector<1x128xf32> to vector<16x128xf32>
    %35 = arith.addf %32, %34 : vector<16x128xf32>
    %36 = arith.truncf %35 : vector<16x128xf32> to vector<16x128xbf16>
    %c0_28 = arith.constant 0 : index
    %c0_29 = arith.constant 0 : index
    %37 = vector.load %arg12[%c0_28, %c0_29] : memref<16x128xbf16, #tpu.memory_space<vmem>>, vector<16x128xbf16>
    tpu.vector_store %arg12[%c0_28, %c0_29], %36 {strides = array<i32>} : memref<16x128xbf16, #tpu.memory_space<vmem>>, vector<16x128xbf16>,
    return
  }
  func.func @transform_0(%arg0: i32) -> (i32, i32) {
    %c0_i32 = arith.constant 0 : i32
    %c0_i32_0 = arith.constant 0 : i32
    return %arg0, %c0_i32 : i32, i32
  }
  func.func @transform_1(%arg0: i32) -> (i32, i32) {
    %c0_i32 = arith.constant 0 : i32
    %c0_i32_0 = arith.constant 0 : i32
    return %arg0, %c0_i32 : i32, i32
  }
  func.func @transform_2(%arg0: i32) -> (i32, i32) {
    %c0_i32 = arith.constant 0 : i32
    %c0_i32_0 = arith.constant 0 : i32
    %c0_i32_1 = arith.constant 0 : i32
    return %c0_i32, %c0_i32_0 : i32, i32
  }
  func.func @transform_3(%arg0: i32) -> (i32, i32) {
    %c0_i32 = arith.constant 0 : i32
    %c0_i32_0 = arith.constant 0 : i32
    %c0_i32_1 = arith.constant 0 : i32
    return %c0_i32, %c0_i32_0 : i32, i32
  }
  func.func @transform_4(%arg0: i32) -> (i32, i32) {
    %c0_i32 = arith.constant 0 : i32
    %c0_i32_0 = arith.constant 0 : i32
    %c0_i32_1 = arith.constant 0 : i32
    return %c0_i32, %c0_i32_0 : i32, i32
  }
  func.func @transform_5(%arg0: i32) -> (i32, i32) {
    %c0_i32 = arith.constant 0 : i32
    %c0_i32_0 = arith.constant 0 : i32
    %c0_i32_1 = arith.constant 0 : i32
    return %c0_i32, %c0_i32_0 : i32, i32
  }
  func.func @transform_6(%arg0: i32) -> (i32, i32) {
    %c0_i32 = arith.constant 0 : i32
    %c0_i32_0 = arith.constant 0 : i32
    %c0_i32_1 = arith.constant 0 : i32
    return %c0_i32, %c0_i32_0 : i32, i32
  }
  func.func @transform_7(%arg0: i32) -> (i32, i32) {
    %c0_i32 = arith.constant 0 : i32
    %c0_i32_0 = arith.constant 0 : i32
    %c0_i32_1 = arith.constant 0 : i32
    return %c0_i32, %c0_i32_0 : i32, i32
  }
  func.func @transform_8(%arg0: i32) -> (i32, i32) {
    %c0_i32 = arith.constant 0 : i32
    %c0_i32_0 = arith.constant 0 : i32
    %c0_i32_1 = arith.constant 0 : i32
    return %c0_i32, %c0_i32_0 : i32, i32
  }
  func.func @transform_9(%arg0: i32) -> (i32, i32) {
    %c0_i32 = arith.constant 0 : i32
    %c0_i32_0 = arith.constant 0 : i32
    %c0_i32_1 = arith.constant 0 : i32
    return %c0_i32, %c0_i32_0 : i32, i32
  }
  func.func @transform_10(%arg0: i32) -> (i32, i32) {
    %c0_i32 = arith.constant 0 : i32
    %c0_i32_0 = arith.constant 0 : i32
    %c0_i32_1 = arith.constant 0 : i32
    return %c0_i32, %c0_i32_0 : i32, i32
  }
  func.func @transform_11(%arg0: i32) -> (i32, i32) {
    %c0_i32 = arith.constant 0 : i32
    %c0_i32_0 = arith.constant 0 : i32
    return %arg0, %c0_i32 : i32, i32
  }
}

</mosaic_0001>

<bundles_post_ra>
// kernel: critic_forward.1
= control target key start
LH: loop header
LB: loop body
LE: loop exit
PB: predicated region body
PF: predicated region fallthrough
CT: control target
= control target key end

     0   :  { %16 = vsyncpa [#allocation3], 0  ;;  %s4594_s0 = inlined_call_operand.hbm [shape: f32[16,32], index: 0, kind: input, shape index: {}]   ;;  %s4595_s1 = inlined_call_operand.hbm [shape: f32[16,8], index: 1, kind: input, shape index: {}]   ;;  %s4596_s2 = inlined_call_operand.hbm [shape: bf16[32,896], index: 2, kind: input, shape index: {}]   ;;  %s4597_s3 = inlined_call_operand.hbm [shape: f32[1,896], index: 3, kind: input, shape index: {}]   ;;  %s4598_s4 = inlined_call_operand.hbm [shape: bf16[896,512], index: 4, kind: input, shape index: {}]   ;;  %s4599_s5 = inlined_call_operand.hbm [shape: bf16[8,512], index: 5, kind: input, shape index: {}]   ;;  %s4600_s6 = inlined_call_operand.hbm [shape: f32[1,512], index: 6, kind: input, shape index: {}]   ;;  %s4601_s7 = inlined_call_operand.hbm [shape: bf16[512,256], index: 7, kind: input, shape index: {}]   ;;  %s4602_s8 = inlined_call_operand.hbm [shape: f32[1,256], index: 8, kind: input, shape index: {}]   ;;  %s4603_s9 = inlined_call_operand.hbm [shape: bf16[256,128], index: 9, kind: input, shape index: {}]   ;;  %s4604_s10 = inlined_call_operand.hbm [shape: f32[1,128], index: 10, kind: input, shape index: {}]   ;;  %s4605_s11 = inlined_call_operand.hbm [shape: bf16[16,128], index: 11, kind: output, shape index: {}]  }
   0x1   :  { %17 = vsyncpa [#allocation6], 0 }
   0x2   :  { %18 = vsyncpa [#allocation9], 0 }
   0x3   :  { %19 = vsyncpa [#allocation12], 0 }
   0x4   :  { %20 = vsyncpa [#allocation15], 0 }
   0x5   :  { %21 = vsyncpa [#allocation18], 0 }
   0x6   :  { %22 = vsyncpa [#allocation4], 0  ;;  %s4232_s17 = smov [#allocation5]   ;;  %s4233_s19 = smov [#allocation8]  }
   0x7   :  { %s40_s18 = sshll.u32 %s4232_s17, 4  ;;  %s65_s20 = sshll.u32 %s4233_s19, 4  ;;  %s41_s18 = int_to_ptr.vmem [resolvable:$true] %s40_s18  ;;  %s4315_s20 = int_to_ptr.vmem [resolvable:$true] %s65_s20 }
   0x8   :  { %s3954_s23 = scalar_lea.hbm %s4595_s1, 256 }
   0x9   :  { %p3955_p0 = scmp.ne.s32.totalorder %s4595_s1, %s3954_s23  ;;  %p3958_p1 = scmp.lt.u32.totalorder %s3954_s23, %s4595_s1 }
   0xb   :  { %p3960_p2 = pnand %p3958_p1, %p3955_p0 }
   0xd   :  { %3963 = shalt.err (!%p3960_p2)
}
   0xe   :  { %s3964_s28 = scalar_lea.vmem %s41_s18, 256  ;;  %p3969_p4 = scmp.lt.s32.totalorder %s41_s18, %s41_s18 }
   0xf   :  { %p3965_p3 = scmp.ne.s32.totalorder %s41_s18, %s3964_s28  ;;  %p3970_p5 = scmp.lt.s32.totalorder %s3964_s28, %s3964_s28 }
  0x11   :  { %p3971_p6 = por %p3970_p5, %p3969_p4 }
  0x13   :  { %p3972_p7 = pnand %p3971_p6, %p3965_p3 }
  0x15   :  { %3975 = shalt.err (!%p3972_p7)
}
  0x16   :  { %s4234_s29 = smov 128   ;;  %s4235_s30 = smov 8  }
  0x17   :  { %46 = dma.hbm_to_vmem [thread:$0]  %s4595_s1, 256, %s41_s18, [#allocation6], %s4234_s29, %s4234_s29, %s4235_s30  }
  0x18   :  { %s3976_s16 = scalar_lea.hbm %s4597_s3, 112 }
  0x19   :  { %p3977_p8 = scmp.ne.s32.totalorder %s4597_s3, %s3976_s16  ;;  %p3980_p9 = scmp.lt.u32.totalorder %s3976_s16, %s4597_s3 }
  0x1b   :  { %p3982_p10 = pnand %p3980_p9, %p3977_p8 }
  0x1d   :  { %3985 = shalt.err (!%p3982_p10)
}
  0x1e   :  { %s3986_s23 = scalar_lea.vmem %s4315_s20, 112  ;;  %s3990_s1 = scalar_lea.vmem %s4315_s20, 128 }
  0x1f   :  { %p3987_p11 = scmp.ne.s32.totalorder %s4315_s20, %s3986_s23  ;;  %p3991_p12 = scmp.lt.s32.totalorder %s4315_s20, %s4315_s20 }
  0x20   :  { %p3992_p13 = scmp.lt.s32.totalorder %s3990_s1, %s3986_s23 }
  0x22   :  { %p3993_p0 = por %p3992_p13, %p3991_p12 }
  0x24   :  { %p3994_p1 = pnand %p3993_p0, %p3987_p11 }
  0x26   :  { %3997 = shalt.err (!%p3994_p1)
}
  0x27   :  { %68 = dma.hbm_to_vmem [thread:$0]  %s4597_s3, 112, %s4315_s20, [#allocation9]  }
  0x28   :  { %s4236_s25 = smov [#allocation11]   ;;  %s4237_s27 = smov [#allocation14]  }
  0x29   :  { %s87_s26 = sshll.u32 %s4236_s25, 4  ;;  %s106_s28 = sshll.u32 %s4237_s27, 4  ;;  %s88_s26 = int_to_ptr.vmem [resolvable:$true] %s87_s26  ;;  %s4350_s28 = int_to_ptr.vmem [resolvable:$true] %s106_s28 }
  0x2a   :  { %s3998_s14 = scalar_lea.hbm %s4599_s5, 256 }
  0x2b   :  { %p3999_p2 = scmp.ne.s32.totalorder %s4599_s5, %s3998_s14  ;;  %p4002_p3 = scmp.lt.u32.totalorder %s3998_s14, %s4599_s5 }
  0x2d   :  { %p4004_p4 = pnand %p4002_p3, %p3999_p2 }
  0x2f   :  { %4007 = shalt.err (!%p4004_p4)
}
  0x30   :  { %s4008_s3 = scalar_lea.vmem %s88_s26, 256  ;;  %p4013_p6 = scmp.lt.s32.totalorder %s88_s26, %s88_s26 }
  0x31   :  { %p4009_p5 = scmp.ne.s32.totalorder %s88_s26, %s4008_s3  ;;  %p4014_p7 = scmp.lt.s32.totalorder %s4008_s3, %s4008_s3 }
  0x33   :  { %p4015_p8 = por %p4014_p7, %p4013_p6 }
  0x35   :  { %p4016_p9 = pnand %p4015_p8, %p4009_p5 }
  0x37   :  { %4019 = shalt.err (!%p4016_p9)
}
  0x38   :  { %90 = dma.hbm_to_vmem [thread:$0]  %s4599_s5, 256, %s88_s26, [#allocation12]  }
  0x39   :  { %s4020_s1 = scalar_lea.hbm %s4601_s7, 8192 }
  0x3a   :  { %p4021_p10 = scmp.ne.s32.totalorder %s4601_s7, %s4020_s1  ;;  %p4024_p11 = scmp.lt.u32.totalorder %s4020_s1, %s4601_s7 }
  0x3c   :  { %p4026_p12 = pnand %p4024_p11, %p4021_p10 }
  0x3e   :  { %4029 = shalt.err (!%p4026_p12)
}
  0x3f   :  { %s4030_s12 = scalar_lea.vmem %s4350_s28, 8192  ;;  %p4035_p0 = scmp.lt.s32.totalorder %s4350_s28, %s4350_s28 }
  0x40   :  { %p4031_p13 = scmp.ne.s32.totalorder %s4350_s28, %s4030_s12  ;;  %p4036_p1 = scmp.lt.s32.totalorder %s4030_s12, %s4030_s12 }
  0x42   :  { %p4037_p2 = por %p4036_p1, %p4035_p0 }
  0x44   :  { %p4038_p3 = pnand %p4037_p2, %p4031_p13 }
  0x46   :  { %4041 = shalt.err (!%p4038_p3)
}
  0x47   :  { %112 = dma.hbm_to_vmem [thread:$0]  %s4601_s7, 8192, %s4350_s28, [#allocation15], %s4234_s29, %s4234_s29, %s4235_s30  }
  0x48   :  { %s4238_s13 = smov [#allocation17]   ;;  %s4042_s17 = scalar_lea.hbm %s4603_s9, 2048 }
  0x49   :  { %s128_s14 = sshll.u32 %s4238_s13, 4  ;;  %p4043_p4 = scmp.ne.s32.totalorder %s4603_s9, %s4042_s17  ;;  %s129_s14 = int_to_ptr.vmem [resolvable:$true] %s128_s14 }
  0x4a   :  { %p4046_p5 = scmp.lt.u32.totalorder %s4042_s17, %s4603_s9 }
  0x4c   :  { %p4048_p6 = pnand %p4046_p5, %p4043_p4 }
  0x4e   :  { %4051 = shalt.err (!%p4048_p6)
}
  0x4f   :  { %s4052_s22 = scalar_lea.vmem %s129_s14, 2048  ;;  %p4057_p8 = scmp.lt.s32.totalorder %s129_s14, %s129_s14 }
  0x50   :  { %p4053_p7 = scmp.ne.s32.totalorder %s129_s14, %s4052_s22  ;;  %p4058_p9 = scmp.lt.s32.totalorder %s4052_s22, %s4052_s22 }
  0x52   :  { %p4059_p10 = por %p4058_p9, %p4057_p8 }
  0x54   :  { %p4060_p11 = pnand %p4059_p10, %p4053_p7 }
  0x56   :  { %4063 = shalt.err (!%p4060_p11)
}
  0x57   :  { %s4239_s7 = smov 64   ;;  %s4240_s28 = smov 4  }
  0x58   :  { %134 = dma.hbm_to_vmem [thread:$0]  %s4603_s9, 2048, %s129_s14, [#allocation18], %s4239_s7, %s4239_s7, %s4240_s28  }
  0x59   :  { %s4241_s18 = smov [#allocation2]   ;;  %s4242_s25 = smov [#allocation7]  }
  0x5a   :  { %s28_s24 = sshll.u32 %s4241_s18, 4  ;;  %s52_s27 = sshll.u32 %s4242_s25, 4  ;;  %s29_s24 = int_to_ptr.vmem [resolvable:$true] %s28_s24  ;;  %s53_s27 = int_to_ptr.vmem [resolvable:$true] %s52_s27 }
  0x5b   :  { %s4064_s26 = scalar_lea.hbm %s4594_s0, 256 }
  0x5c   :  { %p4065_p12 = scmp.ne.s32.totalorder %s4594_s0, %s4064_s26  ;;  %p4068_p13 = scmp.lt.u32.totalorder %s4064_s26, %s4594_s0 }
  0x5e   :  { %p4070_p0 = pnand %p4068_p13, %p4065_p12 }
  0x60   :  { %4073 = shalt.err (!%p4070_p0)
}
  0x61   :  { %s4074_s9 = scalar_lea.vmem %s29_s24, 256  ;;  %p4079_p2 = scmp.lt.s32.totalorder %s29_s24, %s29_s24 }
  0x62   :  { %p4075_p1 = scmp.ne.s32.totalorder %s29_s24, %s4074_s9  ;;  %p4080_p3 = scmp.lt.s32.totalorder %s4074_s9, %s4074_s9 }
  0x64   :  { %p4081_p4 = por %p4080_p3, %p4079_p2 }
  0x66   :  { %p4082_p5 = pnand %p4081_p4, %p4075_p1 }
  0x68   :  { %4085 = shalt.err (!%p4082_p5)
}
  0x69   :  { %34 = dma.hbm_to_vmem [thread:$0]  %s4594_s0, 256, %s29_s24, [#allocation3], %s4234_s29, %s4234_s29, %s4235_s30  }
  0x6a   :  { %s4086_s21 = scalar_lea.hbm %s4596_s2, 1792 }
  0x6b   :  { %p4087_p6 = scmp.ne.s32.totalorder %s4596_s2, %s4086_s21  ;;  %p4090_p7 = scmp.lt.u32.totalorder %s4086_s21, %s4596_s2 }
  0x6d   :  { %p4092_p8 = pnand %p4090_p7, %p4087_p6 }
  0x6f   :  { %4095 = shalt.err (!%p4092_p8)
}
  0x70   :  { %s4096_s25 = scalar_lea.vmem %s53_s27, 1792  ;;  %p4101_p10 = scmp.lt.s32.totalorder %s53_s27, %s53_s27 }
  0x71   :  { %p4097_p9 = scmp.ne.s32.totalorder %s53_s27, %s4096_s25  ;;  %p4102_p11 = scmp.lt.s32.totalorder %s4096_s25, %s4096_s25 }
  0x73   :  { %p4103_p12 = por %p4102_p11, %p4101_p10 }
  0x75   :  { %p4104_p13 = pnand %p4103_p12, %p4097_p9 }
  0x77   :  { %4107 = shalt.err (!%p4104_p13)
}
  0x78   :  { %s4243_s0 = smov 448   ;;  %s4244_s29 = smov 28  }
  0x79   :  { %58 = dma.hbm_to_vmem [thread:$0]  %s4596_s2, 1792, %s53_s27, [#allocation6], %s4243_s0, %s4243_s0, %s4244_s29  }
  0x7a   :  { %s4245_s12 = smov [#allocation10]   ;;  %s4108_s15 = scalar_lea.hbm %s4598_s4, 28672 }
  0x7b   :  { %s74_s5 = sshll.u32 %s4245_s12, 4  ;;  %p4109_p0 = scmp.ne.s32.totalorder %s4598_s4, %s4108_s15  ;;  %s75_s5 = int_to_ptr.vmem [resolvable:$true] %s74_s5 }
  0x7c   :  { %p4112_p1 = scmp.lt.u32.totalorder %s4108_s15, %s4598_s4 }
  0x7e   :  { %p4114_p2 = pnand %p4112_p1, %p4109_p0 }
  0x80   :  { %4117 = shalt.err (!%p4114_p2)
}
  0x81   :  { %s4118_s19 = scalar_lea.vmem %s75_s5, 28672  ;;  %p4123_p4 = scmp.lt.s32.totalorder %s75_s5, %s75_s5 }
  0x82   :  { %p4119_p3 = scmp.ne.s32.totalorder %s75_s5, %s4118_s19  ;;  %p4124_p5 = scmp.lt.s32.totalorder %s4118_s19, %s4118_s19 }
  0x84   :  { %p4125_p6 = por %p4124_p5, %p4123_p4 }
  0x86   :  { %p4126_p7 = pnand %p4125_p6, %p4119_p3 }
  0x88   :  { %4129 = shalt.err (!%p4126_p7)
}
  0x89   :  { %s4246_s2 = smov 256   ;;  %s4247_s27 = smov 16  }
  0x8a   :  { %80 = dma.hbm_to_vmem [thread:$0]  %s4598_s4, 28672, %s75_s5, [#allocation9], %s4246_s2, %s4246_s2, %s4247_s27  }
  0x8b   :  { %s4248_s21 = smov [#allocation13]   ;;  %s4249_s23 = smov [#allocation16]  }
  0x8c   :  { %s97_s22 = sshll.u32 %s4248_s21, 4  ;;  %s119_s1 = sshll.u32 %s4249_s23, 4  ;;  %s98_s22 = int_to_ptr.vmem [resolvable:$true] %s97_s22  ;;  %s120_s1 = int_to_ptr.vmem [resolvable:$true] %s119_s1 }
  0x8d   :  { %s4130_s0 = scalar_lea.hbm %s4600_s6, 64 }
  0x8e   :  { %p4131_p8 = scmp.ne.s32.totalorder %s4600_s6, %s4130_s0  ;;  %p4134_p9 = scmp.lt.u32.totalorder %s4130_s0, %s4600_s6 }
  0x90   :  { %p4136_p10 = pnand %p4134_p9, %p4131_p8 }
  0x92   :  { %4139 = shalt.err (!%p4136_p10)
}
  0x93   :  { %s4140_s4 = scalar_lea.vmem %s98_s22, 64  ;;  %p4145_p12 = scmp.lt.s32.totalorder %s98_s22, %s98_s22 }
  0x94   :  { %p4141_p11 = scmp.ne.s32.totalorder %s98_s22, %s4140_s4  ;;  %p4146_p13 = scmp.lt.s32.totalorder %s4140_s4, %s4140_s4 }
  0x96   :  { %p4147_p0 = por %p4146_p13, %p4145_p12 }
  0x98   :  { %p4148_p1 = pnand %p4147_p0, %p4141_p11 }
  0x9a   :  { %4151 = shalt.err (!%p4148_p1)
}
  0x9b   :  { %100 = dma.hbm_to_vmem [thread:$0]  %s4600_s6, 64, %s98_s22, [#allocation12]  }
  0x9c   :  { %s4152_s16 = scalar_lea.hbm %s4602_s8, 32 }
  0x9d   :  { %p4153_p2 = scmp.ne.s32.totalorder %s4602_s8, %s4152_s16  ;;  %p4156_p3 = scmp.lt.u32.totalorder %s4152_s16, %s4602_s8 }
  0x9f   :  { %p4158_p4 = pnand %p4156_p3, %p4153_p2 }
  0xa1   :  { %4161 = shalt.err (!%p4158_p4)
}
  0xa2   :  { %s4162_s2 = scalar_lea.vmem %s120_s1, 32  ;;  %p4167_p6 = scmp.lt.s32.totalorder %s120_s1, %s120_s1 }
  0xa3   :  { %p4163_p5 = scmp.ne.s32.totalorder %s120_s1, %s4162_s2  ;;  %p4168_p7 = scmp.lt.s32.totalorder %s4162_s2, %s4162_s2 }
  0xa5   :  { %p4169_p8 = por %p4168_p7, %p4167_p6 }
  0xa7   :  { %p4170_p9 = pnand %p4169_p8, %p4163_p5 }
  0xa9   :  { %4173 = shalt.err (!%p4170_p9)
}
  0xaa   :  { %122 = dma.hbm_to_vmem [thread:$0]  %s4602_s8, 32, %s120_s1, [#allocation15]  }
  0xab   :  { %s4250_s3 = smov [#allocation19]   ;;  %s4174_s23 = scalar_lea.hbm %s4604_s10, 16 }
  0xac   :  { %s141_s20 = sshll.u32 %s4250_s3, 4  ;;  %p4175_p10 = scmp.ne.s32.totalorder %s4604_s10, %s4174_s23  ;;  %s142_s20 = int_to_ptr.vmem [resolvable:$true] %s141_s20 }
  0xad   :  { %p4178_p11 = scmp.lt.u32.totalorder %s4174_s23, %s4604_s10 }
  0xaf   :  { %p4180_p12 = pnand %p4178_p11, %p4175_p10 }
  0xb1   :  { %4183 = shalt.err (!%p4180_p12)
}
  0xb2   :  { %s4184_s30 = scalar_lea.vmem %s142_s20, 16  ;;  %s4188_s8 = scalar_lea.vmem %s142_s20, 32 }
  0xb3   :  { %p4185_p13 = scmp.ne.s32.totalorder %s142_s20, %s4184_s30  ;;  %p4189_p0 = scmp.lt.s32.totalorder %s142_s20, %s142_s20 }
  0xb4   :  { %p4190_p1 = scmp.lt.s32.totalorder %s4188_s8, %s4184_s30 }
  0xb6   :  { %p4191_p2 = por %p4190_p1, %p4189_p0 }
  0xb8   :  { %p4192_p3 = pnand %p4191_p2, %p4185_p13 }
  0xba   :  { %4195 = shalt.err (!%p4192_p3)
}
  0xbb   :  { %144 = dma.hbm_to_vmem [thread:$0]  %s4604_s10, 16, %s142_s20, [#allocation18]  }
  0xbc   :  { %4218 = dma.done.wait [#allocation3], 256  }
  0xbd   :  { %4219 = vsyncadd [#allocation3], 4294967040 }
  0xbe   :  { %4220 = dma.done.wait [#allocation6], 2048  }
  0xbf   :  { %4221 = vsyncadd [#allocation6], 4294965248 }
  0xc0   :  { %4222 = dma.done.wait [#allocation9], 28784  }
  0xc1   :  { %4223 = vsyncadd [#allocation9], 4294938512 }
  0xc2   :  { %4224 = dma.done.wait [#allocation12], 320  }
  0xc3   :  { %4225 = vsyncadd [#allocation12], 4294966976 }
  0xc4   :  { %4226 = dma.done.wait [#allocation15], 8224  }
  0xc5   :  { %4227 = vsyncadd [#allocation15], 4294959072 }
  0xc6   :  { %4228 = dma.done.wait [#allocation18], 2064  }
  0xc7   :  { %4229 = vsyncadd [#allocation18], 4294965232  ;;  %v4251_v0 = vmov 0   ;;  %v3482_v1 = vld [vmem:[#allocation7 + $0x4] ss:$28 sps:$4 sm:$0xff]   ;;  %v180_v6 = vld [vmem:[#allocation2 + $0x8] sm:$0xff] }
  0xc8   :  { %346 = vmatprep.mubr.bf16.mxu0 %v4251_v0  ;;  %833 = vmatprep.mubr.bf16.mxu1 %v4251_v0  ;;  %v3484_v2 = vld [vmem:[#allocation7] ss:$28 sps:$4 sm:$0xff]   ;;  %v3487_v4 = vld [vmem:[#allocation7 + $0x38] ss:$28 sps:$4 sm:$0xff]   ;;  %v3490_v7 = vld [vmem:[#allocation7 + $0xc] ss:$28 sps:$4 sm:$0xff]  }
  0xc9   :  { %314 = vmatprep.subr.bf16.mxu0 %v3482_v1  ;;  %v3485_v3 = vld [vmem:[#allocation7 + $0x3c] ss:$28 sps:$4 sm:$0xff]   ;;  %v179_v5 = vld [vmem:[#allocation2] sm:$0xff]  ;;  %vm310_vm0 = vcmask 261120   ;;  %vm745_vm1 = vcmask 1043456   ;;  %v182_v17 = vld [vmem:[#allocation5] sm:$0xff] }
  0xca   :  { %315 = vmatpush1.bf16.msra.mxu0 %v3484_v2  ;;  %v4476_v8 = vpack.c.bf16 %v180_v6, %v179_v5  ;;  %v3488_v9 = vld [vmem:[#allocation7 + $0x8] ss:$28 sps:$4 sm:$0xff]   ;;  %v3491_v11 = vld [vmem:[#allocation7 + $0x40] ss:$28 sps:$4 sm:$0xff]   ;;  %v3496_v13 = vld [vmem:[#allocation7 + $0x14] ss:$28 sps:$4 sm:$0xff]  }
  0xcb   :  { %316 = vmatprep.subr.bf16.mxu0 %v3485_v3  ;;  %v3493_v10 = vld [vmem:[#allocation7 + $0x44] ss:$28 sps:$4 sm:$0xff]   ;;  %v3506_v16 = vld [vmem:[#allocation10 + $0x4] ss:$16 sps:$4 sm:$0xff]   ;;  %v3504_v21 = vld [vmem:[#allocation10] ss:$16 sps:$4 sm:$0xff]  }
  0xcc   :  { %v730_v12 = vld [vmem:[#allocation11 + $0x8] sm:$0xff]  ;;  %v183_v18 = vld [vmem:[#allocation5 + $0x8] sm:$0xff]  ;;  %vm741_vm2 = vcmask 64512   ;;  %v3494_v22 = vld [vmem:[#allocation7 + $0x10] ss:$28 sps:$4 sm:$0xff]   ;;  %v4252_v30 = vmov 0.0  }
  0xcd   :  { %v3067_v14 = vcombine.high %v730_v12, %v730_v12  ;;  %v3066_v15 = vcombine.low %v730_v12, %v730_v12  ;;  %v4483_v20 = vpack.c.bf16 %v183_v18, %v182_v17  ;;  %v3499_v23 = vld [vmem:[#allocation7 + $0x4c] ss:$28 sps:$4 sm:$0xff]   ;;  %v3500_v29 = vld [vmem:[#allocation7 + $0x18] ss:$28 sps:$4 sm:$0xff]   ;;  %vm4253_vm3 = vmmov 0   ;;  %s4254_s10 = smov [#allocation20]  }
  0xce   :  { %317 = vmatpush1.bf16.msra.mxu0 %v3487_v4  ;;  %v3510_v24 = vld [vmem:[#allocation10 + $0x24] ss:$16 sps:$4 sm:$0xff]   ;;  %v3508_v25 = vld [vmem:[#allocation10 + $0x20] ss:$16 sps:$4 sm:$0xff]   ;;  %s3029_s12 = sshll.u32 %s4254_s10, 4  ;;  %s3030_s12 = int_to_ptr.vmem [resolvable:$true] %s3029_s12 }
  0xcf   :  { %357 = vmatprep.subr.bf16.mxu0 %v3490_v7  ;;  %3070 = vmatprep.subr.msk.bf16.mxu1 %vm745_vm1, %v3067_v14  ;;  %v753_v19 = vsel %vm745_vm1, %v3066_v15, 0  ;;  %v3497_v26 = vld [vmem:[#allocation7 + $0x48] ss:$28 sps:$4 sm:$0xff]   ;;  %v3514_v27 = vld [vmem:[#allocation10 + $0x44] ss:$16 sps:$4 sm:$0xff]   ;;  %s4196_s4 = scalar_lea.vmem %s3030_s12, 128  ;;  %p4201_p5 = scmp.lt.s32.totalorder %s3030_s12, %s3030_s12 }
  0xd0   :  { %802 = vmatpush1.bf16.msra.mxu1 %v753_v19  ;;  %v3512_v28 = vld [vmem:[#allocation10 + $0x40] ss:$16 sps:$4 sm:$0xff]   ;;  %v3520_v31 = vld [vmem:[#allocation10 + $0x64] ss:$16 sps:$4 sm:$0xff]   ;;  %p4197_p4 = scmp.ne.s32.totalorder %s3030_s12, %s4196_s4  ;;  %p4202_p6 = scmp.lt.s32.totalorder %s4196_s4, %s4196_s4 }
  0xd1   :  { %3060 = vmatmul.mubr.msk.bf16.vlgmr.msra.gmra.mrb[0].mxu0 %vm310_vm0, %v4476_v8  ;;  %1964 = vmatprep.subr.bf16.mxu1 %v3506_v16  ;;  %v729_v32 = vld [vmem:[#allocation11] sm:$0xff]  ;;  %v3501_v34 = vld [vmem:[#allocation7 + $0x50] ss:$28 sps:$4 sm:$0xff]  }
  0xd2   :  { %358 = vmatpush1.bf16.msra.mxu0 %v3488_v9  ;;  %389 = vmatprep.mubr.bf16.mxu0 %v4251_v0  ;;  %v3518_v33 = vld [vmem:[#allocation10 + $0x60] ss:$16 sps:$4 sm:$0xff]   ;;  %v3526_v35 = vld [vmem:[#allocation10 + $0x84] ss:$16 sps:$4 sm:$0xff]   ;;  %v3065_v36 = vcombine.high %v729_v32, %v729_v32  ;;  %v3064_v37 = vcombine.low %v729_v32, %v729_v32  ;;  %p4203_p7 = por %p4202_p6, %p4201_p5 }
  0xd3   :  { %359 = vmatprep.subr.bf16.mxu0 %v3493_v10  ;;  %3071 = vmatmul.mubr.msk.bf16.vlgmr.msra.gmra.mrb[0].mxu1 %vm741_vm2, %v4483_v20  ;;  %v3524_v38 = vld [vmem:[#allocation10 + $0x80] ss:$16 sps:$4 sm:$0xff]   ;;  %v3517_v39 = vld [vmem:[#allocation10 + $0x204] ss:$16 sps:$4 sm:$0xff]  }
  0xd4   :  { %1965 = vmatpush1.bf16.msra.mxu1 %v3504_v21  ;;  %v747_v40 = vsel %vm745_vm1, %v3064_v37, 0  ;;  %v3532_v41 = vld [vmem:[#allocation10 + $0xa4] ss:$16 sps:$4 sm:$0xff]   ;;  %v3530_v42 = vld [vmem:[#allocation10 + $0xa0] ss:$16 sps:$4 sm:$0xff]   ;;  %p4204_p8 = pnand %p4203_p7, %p4197_p4 }
  0xd5   :  { %1966 = vmatprep.subr.bf16.mxu1 %v3510_v24  ;;  %v3538_v43 = vld [vmem:[#allocation10 + $0xc4] ss:$16 sps:$4 sm:$0xff]   ;;  %v3536_v44 = vld [vmem:[#allocation10 + $0xc0] ss:$16 sps:$4 sm:$0xff]  }
  0xd6   :  { %360 = vmatpush1.bf16.msra.mxu0 %v3491_v11  ;;  %v3515_v45 = vld [vmem:[#allocation10 + $0x200] ss:$16 sps:$4 sm:$0xff]   ;;  %v3544_v46 = vld [vmem:[#allocation10 + $0xe4] ss:$16 sps:$4 sm:$0xff]  }
  0xd7   :  { %400 = vmatprep.subr.bf16.mxu0 %v3496_v13  ;;  %v3523_v47 = vld [vmem:[#allocation10 + $0x224] ss:$16 sps:$4 sm:$0xff]   ;;  %v3542_v48 = vld [vmem:[#allocation10 + $0xe0] ss:$16 sps:$4 sm:$0xff]  }
  0xd8   :  { %1967 = vmatpush1.bf16.msra.mxu1 %v3508_v25  ;;  %v3521_v49 = vld [vmem:[#allocation10 + $0x220] ss:$16 sps:$4 sm:$0xff]   ;;  %v3550_v50 = vld [vmem:[#allocation10 + $0x104] ss:$16 sps:$4 sm:$0xff]  }
  0xd9   :  { %3061 = vmatmul.mubr.msk.bf16.vlgmr.msra.gmra.mrb[4].mxu0 %vm310_vm0, %v4476_v8  ;;  %1968 = vmatprep.subr.bf16.mxu1 %v3514_v27  ;;  %v3529_v51 = vld [vmem:[#allocation10 + $0x244] ss:$16 sps:$4 sm:$0xff]   ;;  %v3527_v52 = vld [vmem:[#allocation10 + $0x240] ss:$16 sps:$4 sm:$0xff]  }
  0xda   :  { %401 = vmatpush1.bf16.msra.mxu0 %v3494_v22  ;;  %432 = vmatprep.mubr.bf16.mxu0 %v4251_v0  ;;  %v3535_v53 = vld [vmem:[#allocation10 + $0x264] ss:$16 sps:$4 sm:$0xff]   ;;  %v3548_v54 = vld [vmem:[#allocation10 + $0x100] ss:$16 sps:$4 sm:$0xff]  }
  0xdb   :  { %402 = vmatprep.subr.bf16.mxu0 %v3499_v23  ;;  %v3556_v55 = vld [vmem:[#allocation10 + $0x124] ss:$16 sps:$4 sm:$0xff]   ;;  %v3554_v56 = vld [vmem:[#allocation10 + $0x120] ss:$16 sps:$4 sm:$0xff]  }
  0xdc   :  { %1969 = vmatpush1.bf16.msra.mxu1 %v3512_v28  ;;  %v3533_v57 = vld [vmem:[#allocation10 + $0x260] ss:$16 sps:$4 sm:$0xff]   ;;  %v3562_v58 = vld [vmem:[#allocation10 + $0x144] ss:$16 sps:$4 sm:$0xff]   ;;  %v3601_v28 = vld [vmem:[#allocation10 + $0xc] ss:$16 sps:$4 sm:$0xff]  }
  0xdd   :  { %1970 = vmatprep.subr.bf16.mxu1 %v3520_v31  ;;  %v3541_v59 = vld [vmem:[#allocation10 + $0x284] ss:$16 sps:$4 sm:$0xff]   ;;  %v3560_v60 = vld [vmem:[#allocation10 + $0x140] ss:$16 sps:$4 sm:$0xff]  }
  0xde   :  { %403 = vmatpush1.bf16.msra.mxu0 %v3497_v26  ;;  %v3539_v61 = vld [vmem:[#allocation10 + $0x280] ss:$16 sps:$4 sm:$0xff]   ;;  %v3568_v62 = vld [vmem:[#allocation10 + $0x164] ss:$16 sps:$4 sm:$0xff]  }
  0xdf   :  { %3411 = vmatprep.subr.bf16.mxu0 %v4252_v30  ;;  %v3547_v63 = vld [vmem:[#allocation10 + $0x2a4] ss:$16 sps:$4 sm:$0xff]   ;;  %v3566_v1 = vld [vmem:[#allocation10 + $0x160] ss:$16 sps:$4 sm:$0xff]  }
  0xe0   :  { %1971 = vmatpush1.bf16.msra.mxu1 %v3518_v33  ;;  %v3545_v2 = vld [vmem:[#allocation10 + $0x2a0] ss:$16 sps:$4 sm:$0xff]   ;;  %v3574_v3 = vld [vmem:[#allocation10 + $0x184] ss:$16 sps:$4 sm:$0xff]   ;;  %v203_v33 = vlaneseq }
  0xe1   :  { %3062 = vmatmul.mubr.msk.bf16.vlgmr.msra.gmra.mrb[8].mxu0 %vm310_vm0, %v4476_v8  ;;  %1972 = vmatprep.subr.bf16.mxu1 %v3526_v35  ;;  %v3553_v4 = vld [vmem:[#allocation10 + $0x2c4] ss:$16 sps:$4 sm:$0xff]   ;;  %v3572_v5 = vld [vmem:[#allocation10 + $0x180] ss:$16 sps:$4 sm:$0xff]  }
  0xe2   :  { %3412 = vmatpush3.bf16.msra.mxu0 %v3500_v29  ;;  %3415 = vmatprep.mubr.msk.bf16.mxu0 %vm4253_vm3, %v4252_v30  ;;  %v3551_v6 = vld [vmem:[#allocation10 + $0x2c0] ss:$16 sps:$4 sm:$0xff]   ;;  %v3580_v7 = vld [vmem:[#allocation10 + $0x1a4] ss:$16 sps:$4 sm:$0xff]  }
  0xe3   :  { %3413 = vmatprep.subr.bf16.mxu0 %v4252_v30  ;;  %v3578_v9 = vld [vmem:[#allocation10 + $0x1a0] ss:$16 sps:$4 sm:$0xff]   ;;  %v3565_v11 = vld [vmem:[#allocation10 + $0x304] ss:$16 sps:$4 sm:$0xff]  }
  0xe4   :  { %1973 = vmatpush1.bf16.msra.mxu1 %v3524_v38  ;;  %v3557_v10 = vld [vmem:[#allocation10 + $0x2e0] ss:$16 sps:$4 sm:$0xff]   ;;  %v3571_v13 = vld [vmem:[#allocation10 + $0x324] ss:$16 sps:$4 sm:$0xff]  }
  0xe5   :  { %1974 = vmatprep.subr.bf16.mxu1 %v3532_v41  ;;  %v3563_v12 = vld [vmem:[#allocation10 + $0x300] ss:$16 sps:$4 sm:$0xff]   ;;  %v3577_v15 = vld [vmem:[#allocation10 + $0x344] ss:$16 sps:$4 sm:$0xff]  }
  0xe6   :  { %3414 = vmatpush3.bf16.msra.mxu0 %v3501_v34  ;;  %v3569_v14 = vld [vmem:[#allocation10 + $0x320] ss:$16 sps:$4 sm:$0xff]   ;;  %v3583_v17 = vld [vmem:[#allocation10 + $0x364] ss:$16 sps:$4 sm:$0xff]   ;;  %v4499_v34 = vshrl.u32 %v203_v33, 7 }
  0xe7   :  { %3068 = vmatprep.subr.msk.bf16.mxu0 %vm745_vm1, %v3065_v36  ;;  %v3575_v16 = vld [vmem:[#allocation10 + $0x340] ss:$16 sps:$4 sm:$0xff]   ;;  %v3586_v19 = vld [vmem:[#allocation10 + $0x1c4] ss:$16 sps:$4 sm:$0xff]   ;;  %v4504_v36 = vld [vmem:[#allocation8] sm:$0xff] }
  0xe8   :  { %1975 = vmatpush1.bf16.msra.mxu1 %v3530_v42  ;;  %v3581_v18 = vld [vmem:[#allocation10 + $0x360] ss:$16 sps:$4 sm:$0xff]   ;;  %v3592_v23 = vld [vmem:[#allocation10 + $0x1e4] ss:$16 sps:$4 sm:$0xff]   ;;  %v4502_v35 = vsub.s32 0, %v4499_v34  ;;  %v4507_v37 = vsub.s32 1, %v4499_v34 }
  0xe9   :  { %3416 = vmatmul.mubr.msk.bf16.vlgmr.msra.gmra.mrb[12].mxu0 %vm310_vm0, %v4476_v8  ;;  %1976 = vmatprep.subr.bf16.mxu1 %v3538_v43  ;;  %v3559_v8 = vld [vmem:[#allocation10 + $0x2e4] ss:$16 sps:$4 sm:$0xff]   ;;  %v3584_v21 = vld [vmem:[#allocation10 + $0x1c0] ss:$16 sps:$4 sm:$0xff]   ;;  %v213_v43 = vsub.s32 2, %v4499_v34 }
  0xea   :  { %759 = vmatpush1.bf16.msra.mxu0 %v747_v40  ;;  %790 = vmatprep.mubr.bf16.mxu0 %v4251_v0  ;;  %v3587_v22 = vld [vmem:[#allocation10 + $0x380] ss:$16 sps:$4 sm:$0xff]   ;;  %v3595_v24 = vld [vmem:[#allocation10 + $0x3a4] ss:$16 sps:$4 sm:$0xff]   ;;  %v206_v38 = vrot.slane %v4504_v36, %v4502_v35 }
  0xeb   :  { %2007 = vmatprep.subr.bf16.mxu0 %v3517_v39  ;;  %v3590_v25 = vld [vmem:[#allocation10 + $0x1e0] ss:$16 sps:$4 sm:$0xff]   ;;  %v3598_v27 = vld [vmem:[#allocation10 + $0x3c4] ss:$16 sps:$4 sm:$0xff]   ;;  %v210_v39 = vrot.slane %v4504_v36, %v4507_v37 }
  0xec   :  { %1977 = vmatpush1.bf16.msra.mxu1 %v3536_v44  ;;  %v3593_v26 = vld [vmem:[#allocation10 + $0x3a0] ss:$16 sps:$4 sm:$0xff]   ;;  %v3604_v30 = vld [vmem:[#allocation10 + $0x3e4] ss:$16 sps:$4 sm:$0xff]  }
  0xed   :  { %1978 = vmatprep.subr.bf16.mxu1 %v3544_v46  ;;  %v3596_v29 = vld [vmem:[#allocation10 + $0x3c0] ss:$16 sps:$4 sm:$0xff]   ;;  %v3610_v32 = vld [vmem:[#allocation10 + $0x404] ss:$16 sps:$4 sm:$0xff]   ;;  %v217_v46 = vsub.s32 3, %v4499_v34 }
  0xee   :  { %v3602_v31 = vld [vmem:[#allocation10 + $0x3e0] ss:$16 sps:$4 sm:$0xff]  }
  0xf0   :  { %1979 = vmatpush1.bf16.msra.mxu1 %v3542_v48 }
  0xf1   :  { %3069 = vmatmul.mubr.msk.bf16.vlgmr.msra.gmra.mrb[16].mxu0 %vm741_vm2, %v4483_v20  ;;  %1980 = vmatprep.subr.bf16.mxu1 %v3550_v50  ;;  %v3589_v20 = vld [vmem:[#allocation10 + $0x384] ss:$16 sps:$4 sm:$0xff]  }
  0xf2   :  { %2008 = vmatpush1.bf16.msra.mxu0 %v3515_v45 }
  0xf3   :  { %2009 = vmatprep.subr.bf16.mxu0 %v3523_v47 }
  0xf4   :  { %1981 = vmatpush1.bf16.msra.mxu1 %v3548_v54 }
  0xf5   :  { %1982 = vmatprep.subr.bf16.mxu1 %v3556_v55  ;;  %v218_v55 = vrot.slane %v4504_v36, %v217_v46 }
  0xf6   :  { %2010 = vmatpush1.bf16.msra.mxu0 %v3521_v49 }
  0xf7   :  { %2011 = vmatprep.subr.bf16.mxu0 %v3529_v51 }
  0xf8   :  { %1983 = vmatpush1.bf16.msra.mxu1 %v3554_v56 }
  0xf9   :  { %1984 = vmatprep.subr.bf16.mxu1 %v3562_v58 }
  0xfa   :  { %2012 = vmatpush1.bf16.msra.mxu0 %v3527_v52  ;;  %v214_v52 = vrot.slane %v4504_v36, %v213_v43 }
  0xfb   :  { %2013 = vmatprep.subr.bf16.mxu0 %v3535_v53 }
  0xfc   :  { %1985 = vmatpush1.bf16.msra.mxu1 %v3560_v60 }
  0xfd   :  { %1986 = vmatprep.subr.bf16.mxu1 %v3568_v62  ;;  %v3607_v62 = vld [vmem:[#allocation10 + $0x2c] ss:$16 sps:$4 sm:$0xff]  }
  0xfe   :  { %2014 = vmatpush1.bf16.msra.mxu0 %v3533_v57 }
  0xff   :  { %2015 = vmatprep.subr.bf16.mxu0 %v3541_v59  ;;  %v3599_v59 = vld [vmem:[#allocation10 + $0x8] ss:$16 sps:$4 sm:$0xff]  }
 0x100   :  { %1987 = vmatpush1.bf16.msra.mxu1 %v3566_v1 }
 0x101   :  { %1988 = vmatprep.subr.bf16.mxu1 %v3574_v3  ;;  %v225_v3 = vsub.s32 5, %v4499_v34 }
 0x102   :  { %2016 = vmatpush1.bf16.msra.mxu0 %v3539_v61 }
 0x103   :  { %2017 = vmatprep.subr.bf16.mxu0 %v3547_v63  ;;  %v221_v63 = vsub.s32 4, %v4499_v34 }
 0x104   :  { %1989 = vmatpush1.bf16.msra.mxu1 %v3572_v5 }
 0x105   :  { %1990 = vmatprep.subr.bf16.mxu1 %v3580_v7 }
 0x106   :  { %2018 = vmatpush1.bf16.msra.mxu0 %v3545_v2 }
 0x107   :  { %2019 = vmatprep.subr.bf16.mxu0 %v3553_v4 }
 0x108   :  { %1991 = vmatpush1.bf16.msra.mxu1 %v3578_v9  ;;  %v3605_v9 = vld [vmem:[#allocation10 + $0x28] ss:$16 sps:$4 sm:$0xff]  }
 0x109   :  { %1992 = vmatprep.subr.bf16.mxu1 %v3586_v19 }
 0x10a   :  { %2020 = vmatpush1.bf16.msra.mxu0 %v3551_v6 }
 0x10b   :  { %2021 = vmatprep.subr.bf16.mxu0 %v3559_v8 }
 0x10c   :  { %1993 = vmatpush1.bf16.msra.mxu1 %v3584_v21  ;;  %v3619_v21 = vld [vmem:[#allocation10 + $0x6c] ss:$16 sps:$4 sm:$0xff]  }
 0x10d   :  { %1994 = vmatprep.subr.bf16.mxu1 %v3592_v23 }
 0x10e   :  { %2022 = vmatpush1.bf16.msra.mxu0 %v3557_v10 }
 0x10f   :  { %2023 = vmatprep.subr.bf16.mxu0 %v3565_v11  ;;  %v3613_v11 = vld [vmem:[#allocation10 + $0x4c] ss:$16 sps:$4 sm:$0xff]  }
 0x110   :  { %1995 = vmatpush1.bf16.msra.mxu1 %v3590_v25 }
 0x111   :  { %2136 = vmatprep.subr.bf16.mxu1 %v3601_v28 }
 0x112   :  { %2024 = vmatpush1.bf16.msra.mxu0 %v3563_v12  ;;  %v222_v12 = vrot.slane %v4504_v36, %v221_v63 }
 0x113   :  { %2025 = vmatprep.subr.bf16.mxu0 %v3571_v13 }
 0x116   :  { %2026 = vmatpush1.bf16.msra.mxu0 %v3569_v14  ;;  %v226_v14 = vrot.slane %v4504_v36, %v225_v3  ;;  %v3640_v3 = vld [vmem:[#allocation10 + $0x4a4] ss:$16 sps:$4 sm:$0xff]  }
 0x117   :  { %2027 = vmatprep.subr.bf16.mxu0 %v3577_v15 }
 0x11a   :  { %2028 = vmatpush1.bf16.msra.mxu0 %v3575_v16 }
 0x11b   :  { %2029 = vmatprep.subr.bf16.mxu0 %v3583_v17  ;;  %v3608_v17 = vld [vmem:[#allocation10 + $0x400] ss:$16 sps:$4 sm:$0xff]  }
 0x11e   :  { %2030 = vmatpush1.bf16.msra.mxu0 %v3581_v18  ;;  %v3611_v18 = vld [vmem:[#allocation10 + $0x48] ss:$16 sps:$4 sm:$0xff]  }
 0x11f   :  { %2031 = vmatprep.subr.bf16.mxu0 %v3589_v20  ;;  %v3616_v20 = vld [vmem:[#allocation10 + $0x424] ss:$16 sps:$4 sm:$0xff]  }
 0x122   :  { %2032 = vmatpush1.bf16.msra.mxu0 %v3587_v22 }
 0x123   :  { %2033 = vmatprep.subr.bf16.mxu0 %v3595_v24  ;;  %v229_v24 = vsub.s32 6, %v4499_v34  ;;  %v3950_v34 = vld [vmem:[#allocation17 + $0x70] sm:$0xff]  }
 0x126   :  { %2034 = vmatpush1.bf16.msra.mxu0 %v3593_v26 }
 0x127   :  { %2035 = vmatprep.subr.bf16.mxu0 %v3598_v27 }
 0x12a   :  { %2036 = vmatpush1.bf16.msra.mxu0 %v3596_v29 }
 0x12b   :  { %2037 = vmatprep.subr.bf16.mxu0 %v3604_v30  ;;  %v3614_v30 = vld [vmem:[#allocation10 + $0x420] ss:$16 sps:$4 sm:$0xff]  }
 0x12e   :  { %2038 = vmatpush1.bf16.msra.mxu0 %v3602_v31  ;;  %v3617_v31 = vld [vmem:[#allocation10 + $0x68] ss:$16 sps:$4 sm:$0xff]  }
 0x12f   :  { %2050 = vmatprep.subr.bf16.mxu0 %v3610_v32 }
 0x1a4   :  { %v348_v40 = vpop.f32.mrb[0].mxu0 }
 0x1a5   :  { %v349_v41 = vadd.f32 %v348_v40, %v206_v38  ;;  %v350_v42 = vpop.f32.mrb[1].mxu0 }
 0x1a6   :  { %v351_v44 = vadd.f32 %v350_v42, %v210_v39  ;;  %v352_v45 = vpop.f32.mrb[2].mxu0 }
 0x1a7   :  { %v353_v47 = vadd.f32 %v352_v45, %v206_v38  ;;  %v354_v48 = vpop.f32.mrb[3].mxu0  ;;  %v484_v50 = vmax.f32 %v349_v41, 0.0  ;;  %v3622_v38 = vld [vmem:[#allocation10 + $0x444] ss:$16 sps:$4 sm:$0xff]   ;;  %v230_v41 = vrot.slane %v4504_v36, %v229_v24  ;;  %v3620_v45 = vld [vmem:[#allocation10 + $0x440] ss:$16 sps:$4 sm:$0xff]  }
 0x1a8   :  { %v355_v49 = vadd.f32 %v354_v48, %v210_v39  ;;  %v485_v53 = vmax.f32 %v351_v44, 0.0  ;;  %v3625_v39 = vld [vmem:[#allocation10 + $0x8c] ss:$16 sps:$4 sm:$0xff]   ;;  %v3665_v24 = vld [vmem:[#allocation10 + $0x168] ss:$16 sps:$4 sm:$0xff]  }
 0x1a9   :  { %v491_v51 = vmax.f32 %v353_v47, 0.0  ;;  %v3623_v47 = vld [vmem:[#allocation10 + $0x88] ss:$16 sps:$4 sm:$0xff]  }
 0x1aa   :  { %v492_v54 = vmax.f32 %v355_v49, 0.0 }
 0x1ab   :  { %v4521_v56 = vpack.c.bf16 %v491_v51, %v484_v50  ;;  %v3628_v50 = vld [vmem:[#allocation10 + $0x464] ss:$16 sps:$4 sm:$0xff]   ;;  %v3631_v51 = vld [vmem:[#allocation10 + $0xac] ss:$16 sps:$4 sm:$0xff]  }
 0x1ac   :  { %v499_v57 = vpack.c.bf16 %v492_v54, %v485_v53  ;;  %v391_v58 = vpop.f32.mrb[4].mxu0 }
 0x1ad   :  { %v392_v60 = vadd.f32 %v391_v58, %v214_v52  ;;  %v393_v61 = vpop.f32.mrb[5].mxu0  ;;  %v3626_v58 = vld [vmem:[#allocation10 + $0x460] ss:$16 sps:$4 sm:$0xff]  }
 0x1ae   :  { %v394_v1 = vadd.f32 %v393_v61, %v218_v55  ;;  %v395_v2 = vpop.f32.mrb[6].mxu0  ;;  %1996 = vmatprep.mubr.bf16.mxu1 %v499_v57  ;;  %v3637_v61 = vld [vmem:[#allocation10 + $0xcc] ss:$16 sps:$4 sm:$0xff]  }
 0x1af   :  { %v486_v4 = vmax.f32 %v392_v60, 0.0  ;;  %v396_v5 = vadd.f32 %v395_v2, %v214_v52  ;;  %v397_v6 = vpop.f32.mrb[7].mxu0  ;;  %1997 = vmatmul.mubr.bf16.vlgmr.msra.gmra.mrb[4].mxu1 %v4521_v56  ;;  %v3634_v60 = vld [vmem:[#allocation10 + $0x484] ss:$16 sps:$4 sm:$0xff]   ;;  %v3635_v2 = vld [vmem:[#allocation10 + $0xc8] ss:$16 sps:$4 sm:$0xff]  }
 0x1b0   :  { %v487_v7 = vmax.f32 %v394_v1, 0.0  ;;  %v398_v8 = vadd.f32 %v397_v6, %v218_v55  ;;  %2137 = vmatpush1.bf16.msra.mxu1 %v3599_v59  ;;  %2168 = vmatprep.mubr.bf16.mxu1 %v499_v57  ;;  %v3629_v59 = vld [vmem:[#allocation10 + $0xa8] ss:$16 sps:$4 sm:$0xff]   ;;  %v3632_v1 = vld [vmem:[#allocation10 + $0x480] ss:$16 sps:$4 sm:$0xff]  }
 0x1b1   :  { %v493_v10 = vmax.f32 %v396_v5, 0.0  ;;  %2138 = vmatprep.subr.bf16.mxu1 %v3607_v62  ;;  %v3638_v5 = vld [vmem:[#allocation10 + $0x4a0] ss:$16 sps:$4 sm:$0xff]   ;;  %v3641_v6 = vld [vmem:[#allocation10 + $0xe8] ss:$16 sps:$4 sm:$0xff]  }
 0x1b2   :  { %v494_v13 = vmax.f32 %v398_v8, 0.0  ;;  %v3649_v8 = vld [vmem:[#allocation10 + $0x10c] ss:$16 sps:$4 sm:$0xff]  }
 0x1b3   :  { %v4528_v15 = vpack.c.bf16 %v493_v10, %v486_v4  ;;  %v3643_v4 = vld [vmem:[#allocation10 + $0xec] ss:$16 sps:$4 sm:$0xff]   ;;  %v3647_v10 = vld [vmem:[#allocation10 + $0x108] ss:$16 sps:$4 sm:$0xff]  }
 0x1b4   :  { %v4530_v16 = vpack.c.bf16 %v494_v13, %v487_v7  ;;  %2139 = vmatpush1.bf16.msra.mxu1 %v3605_v9  ;;  %v434_v19 = vpop.f32.mrb[8].mxu0  ;;  %v3646_v7 = vld [vmem:[#allocation10 + $0x4c4] ss:$16 sps:$4 sm:$0xff]   ;;  %v3644_v9 = vld [vmem:[#allocation10 + $0x4c0] ss:$16 sps:$4 sm:$0xff]  }
 0x1b5   :  { %2140 = vmatprep.subr.bf16.mxu1 %v3613_v11  ;;  %v435_v22 = vadd.f32 %v434_v19, %v222_v12  ;;  %v436_v23 = vpop.f32.mrb[9].mxu0  ;;  %v3652_v11 = vld [vmem:[#allocation10 + $0x4e4] ss:$16 sps:$4 sm:$0xff]   ;;  %v3650_v13 = vld [vmem:[#allocation10 + $0x4e0] ss:$16 sps:$4 sm:$0xff]  }
 0x1b6   :  { %2039 = vmatprep.mubr.bf16.mxu0 %v4530_v16  ;;  %v437_v25 = vadd.f32 %v436_v23, %v226_v14  ;;  %v438_v26 = vpop.f32.mrb[10].mxu0  ;;  %v3656_v19 = vld [vmem:[#allocation10 + $0x500] ss:$16 sps:$4 sm:$0xff]  }
 0x1b7   :  { %2040 = vmatmul.mubr.bf16.vlgmr.msra.gmra.mrb[20].mxu0 %v4528_v15  ;;  %v488_v27 = vmax.f32 %v435_v22, 0.0  ;;  %v439_v28 = vadd.f32 %v438_v26, %v222_v12  ;;  %v440_v29 = vpop.f32.mrb[11].mxu0  ;;  %v3655_v12 = vld [vmem:[#allocation10 + $0x12c] ss:$16 sps:$4 sm:$0xff]   ;;  %v3662_v23 = vld [vmem:[#allocation10 + $0x520] ss:$16 sps:$4 sm:$0xff]  }
 0x1b8   :  { %2051 = vmatpush1.bf16.msra.mxu0 %v3608_v17  ;;  %2141 = vmatpush1.bf16.msra.mxu1 %v3611_v18  ;;  %v489_v32 = vmax.f32 %v437_v25, 0.0  ;;  %v441_v33 = vadd.f32 %v440_v29, %v226_v14  ;;  %v3653_v14 = vld [vmem:[#allocation10 + $0x128] ss:$16 sps:$4 sm:$0xff]   ;;  %v3658_v17 = vld [vmem:[#allocation10 + $0x504] ss:$16 sps:$4 sm:$0xff]  }
 0x1b9   :  { %2052 = vmatprep.subr.bf16.mxu0 %v3616_v20  ;;  %2142 = vmatprep.subr.bf16.mxu1 %v3619_v21  ;;  %v495_v40 = vmax.f32 %v439_v28, 0.0  ;;  %v3661_v18 = vld [vmem:[#allocation10 + $0x14c] ss:$16 sps:$4 sm:$0xff]   ;;  %v3659_v20 = vld [vmem:[#allocation10 + $0x148] ss:$16 sps:$4 sm:$0xff]  }
 0x1ba   :  { %v496_v42 = vmax.f32 %v441_v33, 0.0  ;;  %v3664_v21 = vld [vmem:[#allocation10 + $0x524] ss:$16 sps:$4 sm:$0xff]   ;;  %v3667_v22 = vld [vmem:[#allocation10 + $0x16c] ss:$16 sps:$4 sm:$0xff]  }
 0x1bb   :  { %v4536_v44 = vpack.c.bf16 %v495_v40, %v488_v27  ;;  %v3670_v25 = vld [vmem:[#allocation10 + $0x544] ss:$16 sps:$4 sm:$0xff]   ;;  %v3673_v26 = vld [vmem:[#allocation10 + $0x18c] ss:$16 sps:$4 sm:$0xff]   ;;  %v3668_v27 = vld [vmem:[#allocation10 + $0x540] ss:$16 sps:$4 sm:$0xff]  }
 0x1bc   :  { %2053 = vmatpush1.bf16.msra.mxu0 %v3614_v30  ;;  %2143 = vmatpush1.bf16.msra.mxu1 %v3617_v31  ;;  %v4538_v48 = vpack.c.bf16 %v496_v42, %v489_v32  ;;  %v477_v49 = vpop.f32.mrb[12].mxu0  ;;  %v3671_v28 = vld [vmem:[#allocation10 + $0x188] ss:$16 sps:$4 sm:$0xff]   ;;  %v3676_v29 = vld [vmem:[#allocation10 + $0x564] ss:$16 sps:$4 sm:$0xff]  }
 0x1bd   :  { %2054 = vmatprep.subr.bf16.mxu0 %v3622_v38  ;;  %2144 = vmatprep.subr.bf16.mxu1 %v3625_v39  ;;  %v478_v52 = vadd.f32 %v477_v49, %v230_v41  ;;  %v3417_v53 = vpop.f32.mrb[13].mxu0  ;;  %v3679_v30 = vld [vmem:[#allocation10 + $0x1ac] ss:$16 sps:$4 sm:$0xff]   ;;  %v3674_v31 = vld [vmem:[#allocation10 + $0x560] ss:$16 sps:$4 sm:$0xff]  }
 0x1be   :  { %2082 = vmatprep.mubr.bf16.mxu0 %v4538_v48  ;;  %v480_v54 = vpop.f32.mrb[14].mxu0  ;;  %v3677_v32 = vld [vmem:[#allocation10 + $0x1a8] ss:$16 sps:$4 sm:$0xff]   ;;  %v3682_v33 = vld [vmem:[#allocation10 + $0x584] ss:$16 sps:$4 sm:$0xff]  }
 0x1bf   :  { %v490_v36 = vmax.f32 %v478_v52, 0.0  ;;  %v481_v55 = vadd.f32 %v480_v54, %v230_v41  ;;  %v3418_v57 = vpop.f32.mrb[15].mxu0  ;;  %v3685_v38 = vld [vmem:[#allocation10 + $0x1cc] ss:$16 sps:$4 sm:$0xff]   ;;  %v3680_v39 = vld [vmem:[#allocation10 + $0x580] ss:$16 sps:$4 sm:$0xff]  }
 0x1c0   :  { %2055 = vmatpush1.bf16.msra.mxu0 %v3620_v45  ;;  %2145 = vmatpush1.bf16.msra.mxu1 %v3623_v47  ;;  %v3683_v40 = vld [vmem:[#allocation10 + $0x1c8] ss:$16 sps:$4 sm:$0xff]   ;;  %v3688_v41 = vld [vmem:[#allocation10 + $0x5a4] ss:$16 sps:$4 sm:$0xff]   ;;  %v3691_v42 = vld [vmem:[#allocation10 + $0x1ec] ss:$16 sps:$4 sm:$0xff]  }
 0x1c1   :  { %2056 = vmatprep.subr.bf16.mxu0 %v3628_v50  ;;  %2146 = vmatprep.subr.bf16.mxu1 %v3631_v51  ;;  %v497_v62 = vmax.f32 %v481_v55, 0.0  ;;  %v3686_v45 = vld [vmem:[#allocation10 + $0x5a0] ss:$16 sps:$4 sm:$0xff]   ;;  %v3689_v47 = vld [vmem:[#allocation10 + $0x1e8] ss:$16 sps:$4 sm:$0xff]  }
 0x1c2   :  { %v3694_v49 = vld [vmem:[#allocation10 + $0x5c4] ss:$16 sps:$4 sm:$0xff]   ;;  %v3697_v50 = vld [vmem:[#allocation10 + $0x20c] ss:$16 sps:$4 sm:$0xff]   ;;  %v3692_v51 = vld [vmem:[#allocation10 + $0x5c0] ss:$16 sps:$4 sm:$0xff]  }
 0x1c3   :  { %v4541_v63 = vpack.c.bf16 %v497_v62, %v490_v36  ;;  %v3695_v52 = vld [vmem:[#allocation10 + $0x208] ss:$16 sps:$4 sm:$0xff]   ;;  %v3700_v53 = vld [vmem:[#allocation10 + $0x5e4] ss:$16 sps:$4 sm:$0xff]   ;;  %v3703_v54 = vld [vmem:[#allocation10 + $0x22c] ss:$16 sps:$4 sm:$0xff]  }
 0x1c4   :  { %2057 = vmatpush1.bf16.msra.mxu0 %v3626_v58  ;;  %2147 = vmatpush1.bf16.msra.mxu1 %v3629_v59  ;;  %v3698_v36 = vld [vmem:[#allocation10 + $0x5e0] ss:$16 sps:$4 sm:$0xff]   ;;  %v3701_v55 = vld [vmem:[#allocation10 + $0x228] ss:$16 sps:$4 sm:$0xff]   ;;  %v3706_v57 = vld [vmem:[#allocation10 + $0x604] ss:$16 sps:$4 sm:$0xff]  }
 0x1c5   :  { %2058 = vmatprep.subr.bf16.mxu0 %v3634_v60  ;;  %2148 = vmatprep.subr.bf16.mxu1 %v3637_v61  ;;  %v3709_v58 = vld [vmem:[#allocation10 + $0x24c] ss:$16 sps:$4 sm:$0xff]   ;;  %v3704_v59 = vld [vmem:[#allocation10 + $0x600] ss:$16 sps:$4 sm:$0xff]   ;;  %v3707_v60 = vld [vmem:[#allocation10 + $0x248] ss:$16 sps:$4 sm:$0xff]  }
 0x1c6   :  { %v3712_v61 = vld [vmem:[#allocation10 + $0x624] ss:$16 sps:$4 sm:$0xff]   ;;  %v3715_v62 = vld [vmem:[#allocation10 + $0x26c] ss:$16 sps:$4 sm:$0xff]  }
 0x1c8   :  { %2059 = vmatpush1.bf16.msra.mxu0 %v3632_v1  ;;  %2149 = vmatpush1.bf16.msra.mxu1 %v3635_v2  ;;  %v3713_v1 = vld [vmem:[#allocation10 + $0x268] ss:$16 sps:$4 sm:$0xff]   ;;  %v3721_v2 = vld [vmem:[#allocation10 + $0x28c] ss:$16 sps:$4 sm:$0xff]  }
 0x1c9   :  { %2060 = vmatprep.subr.bf16.mxu0 %v3640_v3  ;;  %2150 = vmatprep.subr.bf16.mxu1 %v3643_v4  ;;  %v3716_v3 = vld [vmem:[#allocation10 + $0x640] ss:$16 sps:$4 sm:$0xff]   ;;  %v3719_v4 = vld [vmem:[#allocation10 + $0x288] ss:$16 sps:$4 sm:$0xff]  }
 0x1cc   :  { %2061 = vmatpush1.bf16.msra.mxu0 %v3638_v5  ;;  %2151 = vmatpush1.bf16.msra.mxu1 %v3641_v6  ;;  %v4547_v5 = vpop.f32.mrb[16].mxu0  ;;  %v3724_v6 = vld [vmem:[#allocation10 + $0x664] ss:$16 sps:$4 sm:$0xff]  }
 0x1cd   :  { %2062 = vmatprep.subr.bf16.mxu0 %v3646_v7  ;;  %2152 = vmatprep.subr.bf16.mxu1 %v3649_v8  ;;  %v3727_v7 = vld [vmem:[#allocation10 + $0x2ac] ss:$16 sps:$4 sm:$0xff]   ;;  %v4549_v8 = vpop.f32.mrb[17].mxu0 }
 0x1d0   :  { %2063 = vmatpush1.bf16.msra.mxu0 %v3644_v9  ;;  %2153 = vmatpush1.bf16.msra.mxu1 %v3647_v10  ;;  %v3722_v9 = vld [vmem:[#allocation10 + $0x660] ss:$16 sps:$4 sm:$0xff]   ;;  %v3725_v10 = vld [vmem:[#allocation10 + $0x2a8] ss:$16 sps:$4 sm:$0xff]  }
 0x1d1   :  { %2064 = vmatprep.subr.bf16.mxu0 %v3652_v11  ;;  %2154 = vmatprep.subr.bf16.mxu1 %v3655_v12  ;;  %v4551_v11 = vpop.f32.mrb[18].mxu0  ;;  %v3730_v12 = vld [vmem:[#allocation10 + $0x684] ss:$16 sps:$4 sm:$0xff]  }
 0x1d4   :  { %2065 = vmatpush1.bf16.msra.mxu0 %v3650_v13  ;;  %2155 = vmatpush1.bf16.msra.mxu1 %v3653_v14  ;;  %v3733_v13 = vld [vmem:[#allocation10 + $0x2cc] ss:$16 sps:$4 sm:$0xff]   ;;  %v4553_v14 = vpop.f32.mrb[19].mxu0 }
 0x1d5   :  { %2066 = vmatprep.subr.bf16.mxu0 %v3658_v17  ;;  %2156 = vmatprep.subr.bf16.mxu1 %v3661_v18  ;;  %v3728_v17 = vld [vmem:[#allocation10 + $0x680] ss:$16 sps:$4 sm:$0xff]   ;;  %v3731_v18 = vld [vmem:[#allocation10 + $0x2c8] ss:$16 sps:$4 sm:$0xff]  }
 0x1d8   :  { %2067 = vmatpush1.bf16.msra.mxu0 %v3656_v19  ;;  %2157 = vmatpush1.bf16.msra.mxu1 %v3659_v20  ;;  %v3736_v19 = vld [vmem:[#allocation10 + $0x6a4] ss:$16 sps:$4 sm:$0xff]   ;;  %v3739_v20 = vld [vmem:[#allocation10 + $0x2ec] ss:$16 sps:$4 sm:$0xff]  }
 0x1d9   :  { %2068 = vmatprep.subr.bf16.mxu0 %v3664_v21  ;;  %2158 = vmatprep.subr.bf16.mxu1 %v3667_v22  ;;  %v3734_v21 = vld [vmem:[#allocation10 + $0x6a0] ss:$16 sps:$4 sm:$0xff]   ;;  %v3737_v22 = vld [vmem:[#allocation10 + $0x2e8] ss:$16 sps:$4 sm:$0xff]  }
 0x1dc   :  { %2069 = vmatpush1.bf16.msra.mxu0 %v3662_v23  ;;  %2159 = vmatpush1.bf16.msra.mxu1 %v3665_v24  ;;  %v3742_v23 = vld [vmem:[#allocation10 + $0x6c4] ss:$16 sps:$4 sm:$0xff]   ;;  %v3745_v24 = vld [vmem:[#allocation10 + $0x30c] ss:$16 sps:$4 sm:$0xff]  }
 0x1dd   :  { %2070 = vmatprep.subr.bf16.mxu0 %v3670_v25  ;;  %2160 = vmatprep.subr.bf16.mxu1 %v3673_v26  ;;  %v3740_v25 = vld [vmem:[#allocation10 + $0x6c0] ss:$16 sps:$4 sm:$0xff]   ;;  %v3743_v26 = vld [vmem:[#allocation10 + $0x308] ss:$16 sps:$4 sm:$0xff]  }
 0x1e0   :  { %2071 = vmatpush1.bf16.msra.mxu0 %v3668_v27  ;;  %2161 = vmatpush1.bf16.msra.mxu1 %v3671_v28  ;;  %v3748_v27 = vld [vmem:[#allocation10 + $0x6e4] ss:$16 sps:$4 sm:$0xff]   ;;  %v3751_v28 = vld [vmem:[#allocation10 + $0x32c] ss:$16 sps:$4 sm:$0xff]  }
 0x1e1   :  { %2072 = vmatprep.subr.bf16.mxu0 %v3676_v29  ;;  %2162 = vmatprep.subr.bf16.mxu1 %v3679_v30  ;;  %v3746_v29 = vld [vmem:[#allocation10 + $0x6e0] ss:$16 sps:$4 sm:$0xff]   ;;  %v3749_v30 = vld [vmem:[#allocation10 + $0x328] ss:$16 sps:$4 sm:$0xff]  }
 0x1e4   :  { %2073 = vmatpush1.bf16.msra.mxu0 %v3674_v31  ;;  %2163 = vmatpush1.bf16.msra.mxu1 %v3677_v32  ;;  %v3754_v31 = vld [vmem:[#allocation10 + $0x34c] ss:$16 sps:$4 sm:$0xff]   ;;  %v3844_v32 = vld [vmem:[#allocation14 + $0x4] ss:$8 sps:$4 sm:$0xff]  }
 0x1e5   :  { %2074 = vmatprep.subr.bf16.mxu0 %v3682_v33  ;;  %2164 = vmatprep.subr.bf16.mxu1 %v3685_v38  ;;  %v3752_v33 = vld [vmem:[#allocation10 + $0x348] ss:$16 sps:$4 sm:$0xff]   ;;  %v3842_v38 = vld [vmem:[#allocation14] ss:$8 sps:$4 sm:$0xff]  }
 0x1e8   :  { %2075 = vmatpush1.bf16.msra.mxu0 %v3680_v39  ;;  %2165 = vmatpush1.bf16.msra.mxu1 %v3683_v40  ;;  %v3757_v39 = vld [vmem:[#allocation10 + $0x36c] ss:$16 sps:$4 sm:$0xff]   ;;  %v3847_v40 = vld [vmem:[#allocation14 + $0x14] ss:$8 sps:$4 sm:$0xff]  }
 0x1e9   :  { %2076 = vmatprep.subr.bf16.mxu0 %v3688_v41  ;;  %2166 = vmatprep.subr.bf16.mxu1 %v3691_v42  ;;  %v3755_v41 = vld [vmem:[#allocation10 + $0x368] ss:$16 sps:$4 sm:$0xff]   ;;  %v3845_v42 = vld [vmem:[#allocation14 + $0x10] ss:$8 sps:$4 sm:$0xff]  }
 0x1ec   :  { %2077 = vmatpush1.bf16.msra.mxu0 %v3686_v45  ;;  %2167 = vmatpush1.bf16.msra.mxu1 %v3689_v47  ;;  %v3760_v45 = vld [vmem:[#allocation10 + $0x38c] ss:$16 sps:$4 sm:$0xff]   ;;  %v3850_v47 = vld [vmem:[#allocation14 + $0x24] ss:$8 sps:$4 sm:$0xff]  }
 0x1ed   :  { %2078 = vmatprep.subr.bf16.mxu0 %v3694_v49  ;;  %2179 = vmatprep.subr.bf16.mxu1 %v3697_v50  ;;  %v3758_v49 = vld [vmem:[#allocation10 + $0x388] ss:$16 sps:$4 sm:$0xff]   ;;  %v3848_v50 = vld [vmem:[#allocation14 + $0x20] ss:$8 sps:$4 sm:$0xff]  }
 0x1ef   :  { %2169 = vmatmul.mubr.bf16.vlgmr.msra.gmra.mrb[0].mxu1 %v4521_v56  ;;  %v3710_v56 = vld [vmem:[#allocation10 + $0x620] ss:$16 sps:$4 sm:$0xff]  }
 0x1f0   :  { %2079 = vmatpush1.bf16.msra.mxu0 %v3692_v51  ;;  %2180 = vmatpush1.bf16.msra.mxu1 %v3695_v52  ;;  %v3763_v51 = vld [vmem:[#allocation10 + $0x3ac] ss:$16 sps:$4 sm:$0xff]   ;;  %v3853_v52 = vld [vmem:[#allocation14 + $0x34] ss:$8 sps:$4 sm:$0xff]  }
 0x1f1   :  { %2211 = vmatprep.mubr.bf16.mxu1 %v4530_v16  ;;  %2080 = vmatprep.subr.bf16.mxu0 %v3700_v53  ;;  %v3718_v16 = vld [vmem:[#allocation10 + $0x644] ss:$16 sps:$4 sm:$0xff]   ;;  %v3761_v53 = vld [vmem:[#allocation10 + $0x3a8] ss:$16 sps:$4 sm:$0xff]  }
 0x1f2   :  { %2181 = vmatprep.subr.bf16.mxu1 %v3703_v54  ;;  %v3851_v54 = vld [vmem:[#allocation14 + $0x30] ss:$8 sps:$4 sm:$0xff]  }
 0x1f4   :  { %2081 = vmatpush1.bf16.msra.mxu0 %v3698_v36  ;;  %2182 = vmatpush1.bf16.msra.mxu1 %v3701_v55  ;;  %v3766_v36 = vld [vmem:[#allocation10 + $0x3cc] ss:$16 sps:$4 sm:$0xff]   ;;  %v3856_v55 = vld [vmem:[#allocation14 + $0x44] ss:$8 sps:$4 sm:$0xff]  }
 0x1f5   :  { %2093 = vmatprep.subr.bf16.mxu0 %v3706_v57  ;;  %2183 = vmatprep.subr.bf16.mxu1 %v3709_v58  ;;  %v3764_v57 = vld [vmem:[#allocation10 + $0x3c8] ss:$16 sps:$4 sm:$0xff]   ;;  %v3854_v58 = vld [vmem:[#allocation14 + $0x40] ss:$8 sps:$4 sm:$0xff]  }
 0x1f7   :  { %2083 = vmatmul.mubr.bf16.vlgmr.msra.gmra.mrb[20].mxu0 %v4536_v44 }
 0x1f8   :  { %2094 = vmatpush1.bf16.msra.mxu0 %v3704_v59  ;;  %2184 = vmatpush1.bf16.msra.mxu1 %v3707_v60  ;;  %v3769_v59 = vld [vmem:[#allocation10 + $0x3ec] ss:$16 sps:$4 sm:$0xff]   ;;  %v3859_v60 = vld [vmem:[#allocation14 + $0x54] ss:$8 sps:$4 sm:$0xff]  }
 0x1f9   :  { %2095 = vmatprep.subr.bf16.mxu0 %v3712_v61  ;;  %2185 = vmatprep.subr.bf16.mxu1 %v3715_v62  ;;  %v3767_v61 = vld [vmem:[#allocation10 + $0x3e8] ss:$16 sps:$4 sm:$0xff]   ;;  %v3857_v62 = vld [vmem:[#allocation14 + $0x50] ss:$8 sps:$4 sm:$0xff]  }
 0x1fa   :  { %2125 = vmatprep.mubr.bf16.mxu0 %v4251_v0 }
 0x1fc   :  { %2096 = vmatpush1.bf16.msra.mxu0 %v3710_v56  ;;  %2186 = vmatpush1.bf16.msra.mxu1 %v3713_v1  ;;  %v3772_v56 = vld [vmem:[#allocation10 + $0x40c] ss:$16 sps:$4 sm:$0xff]   ;;  %v3862_v1 = vld [vmem:[#allocation14 + $0x64] ss:$8 sps:$4 sm:$0xff]  }
 0x1fd   :  { %2097 = vmatprep.subr.bf16.mxu0 %v3718_v16  ;;  %2187 = vmatprep.subr.bf16.mxu1 %v3721_v2  ;;  %v3770_v16 = vld [vmem:[#allocation10 + $0x408] ss:$16 sps:$4 sm:$0xff]   ;;  %v3775_v2 = vld [vmem:[#allocation10 + $0x42c] ss:$16 sps:$4 sm:$0xff]  }
 0x200   :  { %2098 = vmatpush1.bf16.msra.mxu0 %v3716_v3  ;;  %2188 = vmatpush1.bf16.msra.mxu1 %v3719_v4  ;;  %v3860_v3 = vld [vmem:[#allocation14 + $0x60] ss:$8 sps:$4 sm:$0xff]   ;;  %v3865_v4 = vld [vmem:[#allocation14 + $0x74] ss:$8 sps:$4 sm:$0xff]  }
 0x201   :  { %2099 = vmatprep.subr.bf16.mxu0 %v3724_v6  ;;  %2189 = vmatprep.subr.bf16.mxu1 %v3727_v7  ;;  %v3773_v6 = vld [vmem:[#allocation10 + $0x428] ss:$16 sps:$4 sm:$0xff]   ;;  %v3778_v7 = vld [vmem:[#allocation10 + $0x44c] ss:$16 sps:$4 sm:$0xff]  }
 0x204   :  { %2100 = vmatpush1.bf16.msra.mxu0 %v3722_v9  ;;  %2190 = vmatpush1.bf16.msra.mxu1 %v3725_v10  ;;  %v3863_v9 = vld [vmem:[#allocation14 + $0x70] ss:$8 sps:$4 sm:$0xff]   ;;  %v3868_v10 = vld [vmem:[#allocation14 + $0x84] ss:$8 sps:$4 sm:$0xff]  }
 0x205   :  { %2101 = vmatprep.subr.bf16.mxu0 %v3730_v12  ;;  %2191 = vmatprep.subr.bf16.mxu1 %v3733_v13  ;;  %v3776_v12 = vld [vmem:[#allocation10 + $0x448] ss:$16 sps:$4 sm:$0xff]   ;;  %v3781_v13 = vld [vmem:[#allocation10 + $0x46c] ss:$16 sps:$4 sm:$0xff]  }
 0x208   :  { %2102 = vmatpush1.bf16.msra.mxu0 %v3728_v17  ;;  %2192 = vmatpush1.bf16.msra.mxu1 %v3731_v18  ;;  %v3866_v17 = vld [vmem:[#allocation14 + $0x80] ss:$8 sps:$4 sm:$0xff]   ;;  %v3871_v18 = vld [vmem:[#allocation14 + $0x94] ss:$8 sps:$4 sm:$0xff]  }
 0x209   :  { %2103 = vmatprep.subr.bf16.mxu0 %v3736_v19  ;;  %2193 = vmatprep.subr.bf16.mxu1 %v3739_v20  ;;  %v3784_v19 = vld [vmem:[#allocation10 + $0x48c] ss:$16 sps:$4 sm:$0xff]   ;;  %v3874_v20 = vld [vmem:[#allocation14 + $0xa4] ss:$8 sps:$4 sm:$0xff]  }
 0x20c   :  { %2104 = vmatpush1.bf16.msra.mxu0 %v3734_v21  ;;  %2194 = vmatpush1.bf16.msra.mxu1 %v3737_v22  ;;  %v3782_v21 = vld [vmem:[#allocation10 + $0x488] ss:$16 sps:$4 sm:$0xff]   ;;  %v3787_v22 = vld [vmem:[#allocation10 + $0x4ac] ss:$16 sps:$4 sm:$0xff]  }
 0x20d   :  { %2105 = vmatprep.subr.bf16.mxu0 %v3742_v23  ;;  %2195 = vmatprep.subr.bf16.mxu1 %v3745_v24  ;;  %v3872_v23 = vld [vmem:[#allocation14 + $0xa0] ss:$8 sps:$4 sm:$0xff]   ;;  %v3877_v24 = vld [vmem:[#allocation14 + $0xb4] ss:$8 sps:$4 sm:$0xff]  }
 0x210   :  { %2106 = vmatpush1.bf16.msra.mxu0 %v3740_v25  ;;  %2196 = vmatpush1.bf16.msra.mxu1 %v3743_v26  ;;  %v3785_v25 = vld [vmem:[#allocation10 + $0x4a8] ss:$16 sps:$4 sm:$0xff]   ;;  %v3790_v26 = vld [vmem:[#allocation10 + $0x4cc] ss:$16 sps:$4 sm:$0xff]  }
 0x211   :  { %2107 = vmatprep.subr.bf16.mxu0 %v3748_v27  ;;  %2197 = vmatprep.subr.bf16.mxu1 %v3751_v28  ;;  %v3875_v27 = vld [vmem:[#allocation14 + $0xb0] ss:$8 sps:$4 sm:$0xff]   ;;  %v3880_v28 = vld [vmem:[#allocation14 + $0xc4] ss:$8 sps:$4 sm:$0xff]  }
 0x214   :  { %2108 = vmatpush1.bf16.msra.mxu0 %v3746_v29  ;;  %2198 = vmatpush1.bf16.msra.mxu1 %v3749_v30  ;;  %v3788_v29 = vld [vmem:[#allocation10 + $0x4c8] ss:$16 sps:$4 sm:$0xff]   ;;  %v3793_v30 = vld [vmem:[#allocation10 + $0x4ec] ss:$16 sps:$4 sm:$0xff]  }
 0x215   :  { %2199 = vmatprep.subr.bf16.mxu1 %v3754_v31  ;;  %2746 = vmatprep.subr.bf16.mxu0 %v3844_v32  ;;  %v3878_v31 = vld [vmem:[#allocation14 + $0xc0] ss:$8 sps:$4 sm:$0xff]   ;;  %v3791_v32 = vld [vmem:[#allocation10 + $0x4e8] ss:$16 sps:$4 sm:$0xff]  }
 0x217   :  { %2126 = vmatmul.mubr.bf16.vlgmr.msra.gmra.mrb[20].mxu0 %v4541_v63 }
 0x218   :  { %2200 = vmatpush1.bf16.msra.mxu1 %v3752_v33  ;;  %2747 = vmatpush1.bf16.msra.mxu0 %v3842_v38  ;;  %v3796_v33 = vld [vmem:[#allocation10 + $0x50c] ss:$16 sps:$4 sm:$0xff]   ;;  %v3794_v38 = vld [vmem:[#allocation10 + $0x508] ss:$16 sps:$4 sm:$0xff]  }
 0x219   :  { %2201 = vmatprep.subr.bf16.mxu1 %v3757_v39  ;;  %2748 = vmatprep.subr.bf16.mxu0 %v3847_v40  ;;  %v3799_v39 = vld [vmem:[#allocation10 + $0x52c] ss:$16 sps:$4 sm:$0xff]   ;;  %v3797_v40 = vld [vmem:[#allocation10 + $0x528] ss:$16 sps:$4 sm:$0xff]  }
 0x21c   :  { %2202 = vmatpush1.bf16.msra.mxu1 %v3755_v41  ;;  %2749 = vmatpush1.bf16.msra.mxu0 %v3845_v42  ;;  %v3802_v41 = vld [vmem:[#allocation10 + $0x54c] ss:$16 sps:$4 sm:$0xff]   ;;  %v3800_v42 = vld [vmem:[#allocation10 + $0x548] ss:$16 sps:$4 sm:$0xff]  }
 0x21d   :  { %2203 = vmatprep.subr.bf16.mxu1 %v3760_v45  ;;  %2750 = vmatprep.subr.bf16.mxu0 %v3850_v47  ;;  %v3805_v45 = vld [vmem:[#allocation10 + $0x56c] ss:$16 sps:$4 sm:$0xff]   ;;  %v3803_v47 = vld [vmem:[#allocation10 + $0x568] ss:$16 sps:$4 sm:$0xff]  }
 0x220   :  { %2204 = vmatpush1.bf16.msra.mxu1 %v3758_v49  ;;  %2751 = vmatpush1.bf16.msra.mxu0 %v3848_v50  ;;  %v3808_v49 = vld [vmem:[#allocation10 + $0x58c] ss:$16 sps:$4 sm:$0xff]   ;;  %v3806_v50 = vld [vmem:[#allocation10 + $0x588] ss:$16 sps:$4 sm:$0xff]  }
 0x221   :  { %2205 = vmatprep.subr.bf16.mxu1 %v3763_v51  ;;  %2752 = vmatprep.subr.bf16.mxu0 %v3853_v52  ;;  %v3811_v51 = vld [vmem:[#allocation10 + $0x5ac] ss:$16 sps:$4 sm:$0xff]   ;;  %v3809_v52 = vld [vmem:[#allocation10 + $0x5a8] ss:$16 sps:$4 sm:$0xff]  }
 0x224   :  { %2206 = vmatpush1.bf16.msra.mxu1 %v3761_v53  ;;  %2753 = vmatpush1.bf16.msra.mxu0 %v3851_v54  ;;  %v3814_v53 = vld [vmem:[#allocation10 + $0x5cc] ss:$16 sps:$4 sm:$0xff]   ;;  %v3812_v54 = vld [vmem:[#allocation10 + $0x5c8] ss:$16 sps:$4 sm:$0xff]  }
 0x225   :  { %2207 = vmatprep.subr.bf16.mxu1 %v3766_v36  ;;  %2754 = vmatprep.subr.bf16.mxu0 %v3856_v55  ;;  %v3817_v36 = vld [vmem:[#allocation10 + $0x5ec] ss:$16 sps:$4 sm:$0xff]   ;;  %v3815_v55 = vld [vmem:[#allocation10 + $0x5e8] ss:$16 sps:$4 sm:$0xff]  }
 0x228   :  { %2208 = vmatpush1.bf16.msra.mxu1 %v3764_v57  ;;  %2755 = vmatpush1.bf16.msra.mxu0 %v3854_v58  ;;  %v3820_v57 = vld [vmem:[#allocation10 + $0x60c] ss:$16 sps:$4 sm:$0xff]   ;;  %v3883_v58 = vld [vmem:[#allocation14 + $0xd4] ss:$8 sps:$4 sm:$0xff]  }
 0x229   :  { %2209 = vmatprep.subr.bf16.mxu1 %v3769_v59  ;;  %2756 = vmatprep.subr.bf16.mxu0 %v3859_v60  ;;  %v3881_v59 = vld [vmem:[#allocation14 + $0xd0] ss:$8 sps:$4 sm:$0xff]   ;;  %v3818_v60 = vld [vmem:[#allocation10 + $0x608] ss:$16 sps:$4 sm:$0xff]  }
 0x22c   :  { %2210 = vmatpush1.bf16.msra.mxu1 %v3767_v61  ;;  %2757 = vmatpush1.bf16.msra.mxu0 %v3857_v62  ;;  %v3823_v61 = vld [vmem:[#allocation10 + $0x62c] ss:$16 sps:$4 sm:$0xff]   ;;  %v3886_v62 = vld [vmem:[#allocation14 + $0xe4] ss:$8 sps:$4 sm:$0xff]  }
 0x22d   :  { %2222 = vmatprep.subr.bf16.mxu1 %v3772_v56  ;;  %2758 = vmatprep.subr.bf16.mxu0 %v3862_v1  ;;  %v3884_v56 = vld [vmem:[#allocation14 + $0xe0] ss:$8 sps:$4 sm:$0xff]   ;;  %v3821_v1 = vld [vmem:[#allocation10 + $0x628] ss:$16 sps:$4 sm:$0xff]  }
 0x22f   :  { %2212 = vmatmul.mubr.bf16.vlgmr.msra.gmra.mrb[0].mxu1 %v4528_v15  ;;  %v3779_v15 = vld [vmem:[#allocation10 + $0x468] ss:$16 sps:$4 sm:$0xff]  }
 0x230   :  { %2223 = vmatpush1.bf16.msra.mxu1 %v3770_v16  ;;  %2254 = vmatprep.mubr.bf16.mxu1 %v4538_v48  ;;  %v3869_v48 = vld [vmem:[#allocation14 + $0x90] ss:$8 sps:$4 sm:$0xff]  }
 0x231   :  { %2224 = vmatprep.subr.bf16.mxu1 %v3775_v2  ;;  %2759 = vmatpush1.bf16.msra.mxu0 %v3860_v3  ;;  %v3826_v16 = vld [vmem:[#allocation10 + $0x64c] ss:$16 sps:$4 sm:$0xff]   ;;  %v3889_v2 = vld [vmem:[#allocation14 + $0xf4] ss:$8 sps:$4 sm:$0xff]  }
 0x232   :  { %2760 = vmatprep.subr.bf16.mxu0 %v3865_v4  ;;  %v3887_v3 = vld [vmem:[#allocation14 + $0xf0] ss:$8 sps:$4 sm:$0xff]   ;;  %v3824_v4 = vld [vmem:[#allocation10 + $0x648] ss:$16 sps:$4 sm:$0xff]  }
 0x234   :  { %2225 = vmatpush1.bf16.msra.mxu1 %v3773_v6  ;;  %v3829_v6 = vld [vmem:[#allocation10 + $0x66c] ss:$16 sps:$4 sm:$0xff]  }
 0x235   :  { %2226 = vmatprep.subr.bf16.mxu1 %v3778_v7  ;;  %2761 = vmatpush1.bf16.msra.mxu0 %v3863_v9  ;;  %v3892_v7 = vld [vmem:[#allocation14 + $0x104] ss:$8 sps:$4 sm:$0xff]   ;;  %v3832_v9 = vld [vmem:[#allocation10 + $0x68c] ss:$16 sps:$4 sm:$0xff]  }
 0x236   :  { %2762 = vmatprep.subr.bf16.mxu0 %v3868_v10  ;;  %v3835_v10 = vld [vmem:[#allocation10 + $0x6ac] ss:$16 sps:$4 sm:$0xff]  }
 0x238   :  { %2227 = vmatpush1.bf16.msra.mxu1 %v3776_v12  ;;  %v3833_v12 = vld [vmem:[#allocation10 + $0x6a8] ss:$16 sps:$4 sm:$0xff]  }
 0x239   :  { %2228 = vmatprep.subr.bf16.mxu1 %v3781_v13  ;;  %2763 = vmatpush1.bf16.msra.mxu0 %v3866_v17  ;;  %v3838_v13 = vld [vmem:[#allocation10 + $0x6cc] ss:$16 sps:$4 sm:$0xff]  }
 0x23a   :  { %2764 = vmatprep.subr.bf16.mxu0 %v3871_v18 }
 0x23c   :  { %2229 = vmatpush1.bf16.msra.mxu1 %v3779_v15 }
 0x23d   :  { %2230 = vmatprep.subr.bf16.mxu1 %v3784_v19  ;;  %2765 = vmatpush1.bf16.msra.mxu0 %v3869_v48 }
 0x23e   :  { %2766 = vmatprep.subr.bf16.mxu0 %v3874_v20  ;;  %v3836_v20 = vld [vmem:[#allocation10 + $0x6c8] ss:$16 sps:$4 sm:$0xff]  }
 0x240   :  { %2231 = vmatpush1.bf16.msra.mxu1 %v3782_v21 }
 0x241   :  { %2232 = vmatprep.subr.bf16.mxu1 %v3787_v22  ;;  %2767 = vmatpush1.bf16.msra.mxu0 %v3872_v23  ;;  %v3841_v23 = vld [vmem:[#allocation10 + $0x6ec] ss:$16 sps:$4 sm:$0xff]  }
 0x242   :  { %2768 = vmatprep.subr.bf16.mxu0 %v3877_v24 }
 0x244   :  { %2233 = vmatpush1.bf16.msra.mxu1 %v3785_v25  ;;  %v3839_v25 = vld [vmem:[#allocation10 + $0x6e8] ss:$16 sps:$4 sm:$0xff]  }
 0x245   :  { %2234 = vmatprep.subr.bf16.mxu1 %v3790_v26  ;;  %2769 = vmatpush1.bf16.msra.mxu0 %v3875_v27 }
 0x246   :  { %2770 = vmatprep.subr.bf16.mxu0 %v3880_v28 }
 0x248   :  { %2235 = vmatpush1.bf16.msra.mxu1 %v3788_v29 }
 0x249   :  { %2236 = vmatprep.subr.bf16.mxu1 %v3793_v30  ;;  %2771 = vmatpush1.bf16.msra.mxu0 %v3878_v31 }
 0x24a   :  { %2772 = vmatprep.subr.bf16.mxu0 %v3883_v58  ;;  %v3944_v58 = vld [vmem:[#allocation17 + $0x58] sm:$0xff]  }
 0x24c   :  { %2237 = vmatpush1.bf16.msra.mxu1 %v3791_v32 }
 0x24d   :  { %2238 = vmatprep.subr.bf16.mxu1 %v3796_v33  ;;  %2773 = vmatpush1.bf16.msra.mxu0 %v3881_v59  ;;  %v3938_v33 = vld [vmem:[#allocation17 + $0x40] sm:$0xff]   ;;  %v3893_v59 = vld [vmem:[#allocation14 + $0x110] ss:$8 sps:$4 sm:$0xff]  }
 0x24e   :  { %2774 = vmatprep.subr.bf16.mxu0 %v3886_v62  ;;  %v3946_v62 = vld [vmem:[#allocation17 + $0x60] sm:$0xff]  }
 0x250   :  { %2239 = vmatpush1.bf16.msra.mxu1 %v3794_v38  ;;  %v3939_v38 = vld [vmem:[#allocation17] sm:$0xff]  }
 0x251   :  { %2240 = vmatprep.subr.bf16.mxu1 %v3799_v39  ;;  %2775 = vmatpush1.bf16.msra.mxu0 %v3884_v56  ;;  %v3940_v39 = vld [vmem:[#allocation17 + $0x48] sm:$0xff]  }
 0x252   :  { %2776 = vmatprep.subr.bf16.mxu0 %v3889_v2  ;;  %v3896_v56 = vld [vmem:[#allocation14 + $0x120] ss:$8 sps:$4 sm:$0xff]  }
 0x253   :  { %v3948_v2 = vld [vmem:[#allocation17 + $0x68] sm:$0xff]  }
 0x254   :  { %2241 = vmatpush1.bf16.msra.mxu1 %v3797_v40 }
 0x255   :  { %2242 = vmatprep.subr.bf16.mxu1 %v3802_v41  ;;  %2777 = vmatpush1.bf16.msra.mxu0 %v3887_v3  ;;  %v3899_v3 = vld [vmem:[#allocation14 + $0x130] ss:$8 sps:$4 sm:$0xff]  }
 0x256   :  { %2789 = vmatprep.subr.bf16.mxu0 %v3892_v7  ;;  %v3907_v7 = vld [vmem:[#allocation14 + $0x154] ss:$8 sps:$4 sm:$0xff]  }
 0x258   :  { %2243 = vmatpush1.bf16.msra.mxu1 %v3800_v42 }
 0x259   :  { %2244 = vmatprep.subr.bf16.mxu1 %v3805_v45  ;;  %v3941_v45 = vld [vmem:[#allocation17 + $0x8] sm:$0xff]  }
 0x25c   :  { %2245 = vmatpush1.bf16.msra.mxu1 %v3803_v47 }
 0x25d   :  { %2246 = vmatprep.subr.bf16.mxu1 %v3808_v49 }
 0x260   :  { %2247 = vmatpush1.bf16.msra.mxu1 %v3806_v50  ;;  %v3942_v50 = vld [vmem:[#allocation17 + $0x50] sm:$0xff]  }
 0x261   :  { %2248 = vmatprep.subr.bf16.mxu1 %v3811_v51 }
 0x264   :  { %2249 = vmatpush1.bf16.msra.mxu1 %v3809_v52 }
 0x265   :  { %2250 = vmatprep.subr.bf16.mxu1 %v3814_v53 }
 0x268   :  { %2251 = vmatpush1.bf16.msra.mxu1 %v3812_v54 }
 0x269   :  { %2252 = vmatprep.subr.bf16.mxu1 %v3817_v36  ;;  %v3890_v36 = vld [vmem:[#allocation14 + $0x100] ss:$8 sps:$4 sm:$0xff]  }
 0x26c   :  { %2253 = vmatpush1.bf16.msra.mxu1 %v3815_v55  ;;  %v3943_v55 = vld [vmem:[#allocation17 + $0x10] sm:$0xff]  }
 0x26d   :  { %2265 = vmatprep.subr.bf16.mxu1 %v3820_v57  ;;  %v3895_v57 = vld [vmem:[#allocation14 + $0x114] ss:$8 sps:$4 sm:$0xff]  }
 0x26f   :  { %2255 = vmatmul.mubr.bf16.vlgmr.msra.gmra.mrb[0].mxu1 %v4536_v44  ;;  %v3827_v44 = vld [vmem:[#allocation10 + $0x668] ss:$16 sps:$4 sm:$0xff]  }
 0x270   :  { %2266 = vmatpush1.bf16.msra.mxu1 %v3818_v60  ;;  %2297 = vmatprep.mubr.bf16.mxu1 %v4251_v0  ;;  %v3830_v0 = vld [vmem:[#allocation10 + $0x688] ss:$16 sps:$4 sm:$0xff]   ;;  %v3945_v60 = vld [vmem:[#allocation17 + $0x18] sm:$0xff]  }
 0x271   :  { %2267 = vmatprep.subr.bf16.mxu1 %v3823_v61  ;;  %v3898_v61 = vld [vmem:[#allocation14 + $0x124] ss:$8 sps:$4 sm:$0xff]  }
 0x274   :  { %2268 = vmatpush1.bf16.msra.mxu1 %v3821_v1  ;;  %v3947_v1 = vld [vmem:[#allocation17 + $0x20] sm:$0xff]  }
 0x275   :  { %2269 = vmatprep.subr.bf16.mxu1 %v3826_v16  ;;  %v3901_v16 = vld [vmem:[#allocation14 + $0x134] ss:$8 sps:$4 sm:$0xff]  }
 0x278   :  { %2270 = vmatpush1.bf16.msra.mxu1 %v3824_v4  ;;  %v3904_v4 = vld [vmem:[#allocation14 + $0x144] ss:$8 sps:$4 sm:$0xff]  }
 0x279   :  { %2271 = vmatprep.subr.bf16.mxu1 %v3829_v6  ;;  %v3902_v6 = vld [vmem:[#allocation14 + $0x140] ss:$8 sps:$4 sm:$0xff]  }
 0x27c   :  { %2272 = vmatpush1.bf16.msra.mxu1 %v3827_v44  ;;  %v3905_v44 = vld [vmem:[#allocation14 + $0x150] ss:$8 sps:$4 sm:$0xff]  }
 0x27d   :  { %2273 = vmatprep.subr.bf16.mxu1 %v3832_v9  ;;  %v3910_v9 = vld [vmem:[#allocation14 + $0x164] ss:$8 sps:$4 sm:$0xff]  }
 0x280   :  { %2274 = vmatpush1.bf16.msra.mxu1 %v3830_v0  ;;  %v3908_v0 = vld [vmem:[#allocation14 + $0x160] ss:$8 sps:$4 sm:$0xff]  }
 0x281   :  { %2275 = vmatprep.subr.bf16.mxu1 %v3835_v10  ;;  %v3913_v10 = vld [vmem:[#allocation14 + $0x174] ss:$8 sps:$4 sm:$0xff]  }
 0x282   :  { %v1998_v17 = vpop.f32.mrb[4].mxu1 }
 0x283   :  { %v1999_v18 = vadd.f32 %v1998_v17, %v4547_v5  ;;  %v2000_v15 = vpop.f32.mrb[5].mxu1  ;;  %v4565_v5 = vld [vmem:[#allocation13] sm:$0xf]  ;;  %v3914_v17 = vld [vmem:[#allocation14 + $0x180] ss:$8 sps:$4 sm:$0xff]  }
 0x284   :  { %v2001_v19 = vadd.f32 %v2000_v15, %v4549_v8  ;;  %2276 = vmatpush1.bf16.msra.mxu1 %v3833_v12  ;;  %v2002_v48 = vpop.f32.mrb[6].mxu1  ;;  %v2313_v8 = vrot.slane %v4565_v5, %v4502_v35  ;;  %v3911_v12 = vld [vmem:[#allocation14 + $0x170] ss:$8 sps:$4 sm:$0xff]  }
 0x285   :  { %v2003_v21 = vadd.f32 %v2002_v48, %v4551_v11  ;;  %v2004_v22 = vpop.f32.mrb[7].mxu1  ;;  %2277 = vmatprep.subr.bf16.mxu1 %v3838_v13  ;;  %v2317_v11 = vrot.slane %v4565_v5, %v4507_v37  ;;  %v3916_v13 = vld [vmem:[#allocation14 + $0x184] ss:$8 sps:$4 sm:$0xff]   ;;  %v3917_v15 = vld [vmem:[#allocation14 + $0x190] ss:$8 sps:$4 sm:$0xff]  }
 0x286   :  { %v2005_v24 = vadd.f32 %v2004_v22, %v4553_v14  ;;  %v3920_v48 = vld [vmem:[#allocation14 + $0x1a0] ss:$8 sps:$4 sm:$0xff]   ;;  %v3928_v22 = vld [vmem:[#allocation14 + $0x1c4] ss:$8 sps:$4 sm:$0xff]  }
 0x288   :  { %2278 = vmatpush1.bf16.msra.mxu1 %v3836_v20  ;;  %v3925_v20 = vld [vmem:[#allocation14 + $0x1b4] ss:$8 sps:$4 sm:$0xff]  }
 0x289   :  { %2279 = vmatprep.subr.bf16.mxu1 %v3841_v23  ;;  %v3926_v23 = vld [vmem:[#allocation14 + $0x1c0] ss:$8 sps:$4 sm:$0xff]  }
 0x28c   :  { %2280 = vmatpush1.bf16.msra.mxu1 %v3839_v25  ;;  %v3929_v25 = vld [vmem:[#allocation14 + $0x1d0] ss:$8 sps:$4 sm:$0xff]  }
 0x28d   :  { %3389 = vmatprep.subr.bf16.mxu1 %v3938_v33 }
 0x28f   :  { %2298 = vmatmul.mubr.bf16.vlgmr.msra.gmra.mrb[0].mxu1 %v4541_v63 }
 0x290   :  { %3390 = vmatpush3.bf16.msra.mxu1 %v3939_v38 }
 0x291   :  { %3391 = vmatprep.subr.bf16.mxu1 %v3940_v39 }
 0x294   :  { %3392 = vmatpush3.bf16.msra.mxu1 %v3941_v45 }
 0x295   :  { %3393 = vmatprep.subr.bf16.mxu1 %v3942_v50  ;;  %v3953_v50 = vld [vmem:[#allocation17 + $0x38] sm:$0xff]  }
 0x298   :  { %3394 = vmatpush3.bf16.msra.mxu1 %v3943_v55 }
 0x299   :  { %3395 = vmatprep.subr.bf16.mxu1 %v3944_v58 }
 0x29c   :  { %3396 = vmatpush3.bf16.msra.mxu1 %v3945_v60 }
 0x29d   :  { %3397 = vmatprep.subr.bf16.mxu1 %v3946_v62 }
 0x2a0   :  { %3398 = vmatpush3.bf16.msra.mxu1 %v3947_v1 }
 0x2a1   :  { %3399 = vmatprep.subr.bf16.mxu1 %v3948_v2 }
 0x2ea   :  { %v2127_v26 = vpop.f32.mrb[20].mxu0 }
 0x2eb   :  { %v3420_v27 = vadd.f32 %v2127_v26, %v1999_v18  ;;  %v2129_v28 = vpop.f32.mrb[21].mxu0  ;;  %v3919_v18 = vld [vmem:[#allocation14 + $0x194] ss:$8 sps:$4 sm:$0xff]   ;;  %v3932_v26 = vld [vmem:[#allocation14 + $0x1e0] ss:$8 sps:$4 sm:$0xff]  }
 0x2ec   :  { %v3422_v29 = vadd.f32 %v2129_v28, %v2001_v19  ;;  %v2131_v30 = vpop.f32.mrb[22].mxu0  ;;  %v3922_v19 = vld [vmem:[#allocation14 + $0x1a4] ss:$8 sps:$4 sm:$0xff]   ;;  %v2321_v28 = vrot.slane %v4565_v5, %v213_v43 }
 0x2ed   :  { %v2330_v14 = vadd.f32 %v3420_v27, %v2313_v8  ;;  %v3424_v31 = vadd.f32 %v2131_v30, %v2003_v21  ;;  %v2133_v32 = vpop.f32.mrb[23].mxu0  ;;  %v3923_v21 = vld [vmem:[#allocation14 + $0x1b0] ss:$8 sps:$4 sm:$0xff]  }
 0x2ee   :  { %v2331_v63 = vadd.f32 %v3422_v29, %v2317_v11  ;;  %v3426_v40 = vadd.f32 %v2133_v32, %v2005_v24  ;;  %v3931_v24 = vld [vmem:[#allocation14 + $0x1d4] ss:$8 sps:$4 sm:$0xff]   ;;  %v3935_v27 = vld [vmem:[#allocation14 + $0x1f0] ss:$8 sps:$4 sm:$0xff]   ;;  %v2325_v29 = vrot.slane %v4565_v5, %v217_v46 }
 0x2ef   :  { %v2334_v41 = vadd.f32 %v3424_v31, %v2313_v8  ;;  %v2338_v47 = vmax.f32 %v2330_v14, 0.0  ;;  %v3934_v8 = vld [vmem:[#allocation14 + $0x1e4] ss:$8 sps:$4 sm:$0xff]   ;;  %v3951_v46 = vld [vmem:[#allocation17 + $0x30] sm:$0xff]   ;;  %v3952_v5 = vld [vmem:[#allocation17 + $0x78] sm:$0xff]  }
 0x2f0   :  { %v2335_v42 = vadd.f32 %v3426_v40, %v2317_v11  ;;  %v2339_v51 = vmax.f32 %v2331_v63, 0.0  ;;  %v3937_v11 = vld [vmem:[#allocation14 + $0x1f4] ss:$8 sps:$4 sm:$0xff]   ;;  %v3949_v43 = vld [vmem:[#allocation17 + $0x28] sm:$0xff]  }
 0x2f1   :  { %v2342_v49 = vmax.f32 %v2334_v41, 0.0  ;;  %3400 = vmatpush3.bf16.msra.mxu1 %v3949_v43 }
 0x2f2   :  { %v2343_v52 = vmax.f32 %v2335_v42, 0.0  ;;  %3401 = vmatprep.subr.bf16.mxu1 %v3950_v34 }
 0x2f3   :  { %v2346_v53 = vpack.c.bf16 %v2342_v49, %v2338_v47 }
 0x2f4   :  { %v2347_v54 = vpack.c.bf16 %v2343_v52, %v2339_v51  ;;  %v2414_v51 = vld [vmem:[#allocation16] sm:$0x3] }
 0x2f5   :  { %3402 = vmatpush3.bf16.msra.mxu1 %v3951_v46  ;;  %v2419_v52 = vrot.slane %v2414_v51, %v4502_v35 }
 0x2f6   :  { %2778 = vmatprep.mubr.bf16.mxu0 %v2347_v54  ;;  %3403 = vmatprep.subr.bf16.mxu1 %v3952_v5 }
 0x2f7   :  { %2779 = vmatmul.mubr.bf16.vlgmr.msra.gmra.mrb[24].mxu0 %v2346_v53  ;;  %v2423_v53 = vrot.slane %v2414_v51, %v4507_v37 }
 0x2f8   :  { %2790 = vmatpush1.bf16.msra.mxu0 %v3890_v36 }
 0x2f9   :  { %2791 = vmatprep.subr.bf16.mxu0 %v3895_v57  ;;  %3404 = vmatpush3.bf16.msra.mxu1 %v3953_v50 }
 0x2fc   :  { %2792 = vmatpush1.bf16.msra.mxu0 %v3893_v59 }
 0x2fd   :  { %2793 = vmatprep.subr.bf16.mxu0 %v3898_v61 }
 0x300   :  { %2794 = vmatpush1.bf16.msra.mxu0 %v3896_v56 }
 0x301   :  { %2795 = vmatprep.subr.bf16.mxu0 %v3901_v16 }
 0x304   :  { %2796 = vmatpush1.bf16.msra.mxu0 %v3899_v3 }
 0x305   :  { %2797 = vmatprep.subr.bf16.mxu0 %v3904_v4 }
 0x308   :  { %2798 = vmatpush1.bf16.msra.mxu0 %v3902_v6 }
 0x309   :  { %2799 = vmatprep.subr.bf16.mxu0 %v3907_v7  ;;  %v3360_v7 = vld [vmem:[#allocation19] ss:$0 sm:$0xff] }
 0x30c   :  { %2800 = vmatpush1.bf16.msra.mxu0 %v3905_v44 }
 0x30d   :  { %2801 = vmatprep.subr.bf16.mxu0 %v3910_v9 }
 0x310   :  { %2802 = vmatpush1.bf16.msra.mxu0 %v3908_v0 }
 0x311   :  { %2803 = vmatprep.subr.bf16.mxu0 %v3913_v10 }
 0x314   :  { %2804 = vmatpush1.bf16.msra.mxu0 %v3911_v12 }
 0x315   :  { %2805 = vmatprep.subr.bf16.mxu0 %v3916_v13 }
 0x318   :  { %2806 = vmatpush1.bf16.msra.mxu0 %v3914_v17 }
 0x319   :  { %2807 = vmatprep.subr.bf16.mxu0 %v3919_v18 }
 0x31c   :  { %2808 = vmatpush1.bf16.msra.mxu0 %v3917_v15 }
 0x31d   :  { %2809 = vmatprep.subr.bf16.mxu0 %v3922_v19 }
 0x320   :  { %2810 = vmatpush1.bf16.msra.mxu0 %v3920_v48 }
 0x321   :  { %2811 = vmatprep.subr.bf16.mxu0 %v3925_v20 }
 0x324   :  { %2812 = vmatpush1.bf16.msra.mxu0 %v3923_v21 }
 0x325   :  { %2813 = vmatprep.subr.bf16.mxu0 %v3928_v22 }
 0x328   :  { %2814 = vmatpush1.bf16.msra.mxu0 %v3926_v23 }
 0x329   :  { %2815 = vmatprep.subr.bf16.mxu0 %v3931_v24 }
 0x32c   :  { %2816 = vmatpush1.bf16.msra.mxu0 %v3929_v25 }
 0x32d   :  { %2817 = vmatprep.subr.bf16.mxu0 %v3934_v8 }
 0x330   :  { %2818 = vmatpush1.bf16.msra.mxu0 %v3932_v26 }
 0x331   :  { %2819 = vmatprep.subr.bf16.mxu0 %v3937_v11 }
 0x334   :  { %2820 = vmatpush1.bf16.msra.mxu0 %v3935_v27 }
 0x362   :  { %v2299_v30 = vpop.f32.mrb[0].mxu1 }
 0x363   :  { %v2332_v14 = vadd.f32 %v2321_v28, %v2299_v30  ;;  %v2301_v31 = vpop.f32.mrb[1].mxu1 }
 0x364   :  { %v2333_v32 = vadd.f32 %v2325_v29, %v2301_v31  ;;  %v2303_v33 = vpop.f32.mrb[2].mxu1 }
 0x365   :  { %v2336_v38 = vadd.f32 %v2321_v28, %v2303_v33  ;;  %v2305_v39 = vpop.f32.mrb[3].mxu1  ;;  %v2340_v40 = vmax.f32 %v2332_v14, 0.0 }
 0x366   :  { %v2337_v63 = vadd.f32 %v2325_v29, %v2305_v39  ;;  %v2341_v42 = vmax.f32 %v2333_v32, 0.0 }
 0x367   :  { %v2344_v41 = vmax.f32 %v2336_v38, 0.0 }
 0x368   :  { %v2345_v45 = vmax.f32 %v2337_v63, 0.0 }
 0x369   :  { %v2348_v47 = vpack.c.bf16 %v2344_v41, %v2340_v40 }
 0x36a   :  { %v2349_v49 = vpack.c.bf16 %v2345_v45, %v2341_v42 }
 0x36c   :  { %2821 = vmatprep.mubr.bf16.mxu0 %v2349_v49 }
 0x36d   :  { %2822 = vmatmul.mubr.bf16.vlgmr.msra.gmra.mrb[24].mxu0 %v2348_v47 }
 0x440   :  { %v2823_v54 = vpop.f32.mrb[24].mxu0 }
 0x441   :  { %v3427_v36 = vadd.f32 %v2823_v54, %v2419_v52  ;;  %v2825_v55 = vpop.f32.mrb[25].mxu0 }
 0x442   :  { %v3428_v57 = vadd.f32 %v2825_v55, %v2423_v53  ;;  %v2827_v58 = vpop.f32.mrb[26].mxu0 }
 0x443   :  { %v3429_v59 = vadd.f32 %v2827_v58, %v2419_v52  ;;  %v2829_v60 = vpop.f32.mrb[27].mxu0  ;;  %v2832_v62 = vmax.f32 %v3427_v36, 0.0 }
 0x444   :  { %v3430_v61 = vadd.f32 %v2829_v60, %v2423_v53  ;;  %v2833_v1 = vmax.f32 %v3428_v57, 0.0 }
 0x445   :  { %v2834_v56 = vmax.f32 %v3429_v59, 0.0 }
 0x446   :  { %v2835_v16 = vmax.f32 %v3430_v61, 0.0 }
 0x447   :  { %v2836_v2 = vpack.c.bf16 %v2834_v56, %v2832_v62 }
 0x448   :  { %v2837_v3 = vpack.c.bf16 %v2835_v16, %v2833_v1 }
 0x44a   :  { %3005 = vmatprep.mubr.bf16.mxu1 %v2837_v3 }
 0x44b   :  { %3006 = vmatmul.mubr.bf16.vlgmr.msra.gmra.mrb[8].mxu1 %v2836_v2 }
 0x51e   :  { %v3405_v4 = vpop.f32.mrb[8].mxu1 }
 0x51f   :  { %v3406_v35 = vpop.f32.mrb[9].mxu1 }
 0x520   :  { %v3407_v6 = vadd.f32 %v3406_v35, %v3405_v4  ;;  %v3408_v37 = vpop.f32.mrb[10].mxu1 }
 0x521   :  { %v3409_v44 = vpop.f32.mrb[11].mxu1 }
 0x522   :  { %v3410_v9 = vadd.f32 %v3409_v44, %v3408_v37  ;;  %v3008_v0 = vadd.f32 %v3407_v6, %v3360_v7 }
 0x524   :  { %v3011_v10 = vadd.f32 %v3410_v9, %v3360_v7 }
 0x526   :  { %v3384_v12 = vpack.c.bf16 %v3011_v10, %v3008_v0 }
 0x528   :  { %3385 = vst [vmem:[#allocation20] sm:$0xff] %v3384_v12  }
 0x529   :  { %4207 = shalt.err (!%p4204_p8)
}
 0x52a   :  { %s4208_s13 = scalar_lea.hbm %s4605_s11, 128 }
 0x52b   :  { %p4209_p9 = scmp.ne.s32.totalorder %s4605_s11, %s4208_s13  ;;  %p4212_p10 = scmp.lt.u32.totalorder %s4208_s13, %s4605_s11 }
 0x52d   :  { %p4214_p11 = pnand %p4212_p10, %p4209_p9 }
 0x52f   :  { %4217 = shalt.err (!%p4214_p11)
}
 0x530   :  { %3035 = dma.vmem_to_hbm [thread:$0]  %s3030_s12, 128, %s4605_s11, [#allocation4], %s4239_s7, %s4239_s7, %s4240_s28  }
 0x531   :  { %4230 = dma.done.wait [#allocation4], 128  }
 0x532   :  { %4231 = vsyncadd [#allocation4], 4294967168 }
 0x533   :  { %3039 = vsyncpa [#allocation3], 1 }
 0x534   :  { %3040 = vsyncpa [#allocation6], 1 }
 0x535   :  { %3041 = vsyncpa [#allocation9], 1 }
 0x536   :  { %3042 = vsyncpa [#allocation12], 1 }
 0x537   :  { %3043 = vsyncpa [#allocation15], 1 }
 0x538   :  { %3044 = vsyncpa [#allocation18], 1 }
 0x539   :  { %3045 = vsyncpa [#allocation4], 1 }

</bundles_post_ra>
